<compile_context>
chip_gen: v7x
topology: tpu7x:2x2x1
jax: 0.10.0
libtpu: 0.0.40
codegen_flags: <defaults>
</compile_context>

<pallas_src>
import functools

import jax
import jax.numpy as jnp
from jax.experimental import pallas as pl
from jax.experimental.pallas import tpu as pltpu  # noqa: F401  (TPU backend)

# ----------------------------- hyperparameters -----------------------------
HIDDEN_DIM = 32
PROJECTION_DIM = 64
N_HEADS = 2
HEAD_DIM = 16
BATCH = 2
TGT_LEN = 8        # decoder (tgt) sequence length
SRC_LEN = 16       # encoder (src) sequence length


# ----------------------------- in-kernel helpers -----------------------------
def _layernorm(x, gamma, beta, eps=1e-5):
    mean = jnp.mean(x, axis=-1, keepdims=True)
    var = jnp.mean((x - mean) ** 2, axis=-1, keepdims=True)
    return (x - mean) * jax.lax.rsqrt(var + eps) * gamma + beta


def _mha(q2, kv2, mask, prob_ref, wq, bq, wk, bk, wv, bv, wo, bo, g, beta,
         *, batch, q_len, kv_len, n_heads, head_dim):
    """Post-LN multi-head attention on flattened activations.

    q2   : [B*q_len, D]   (also the residual input / query)
    kv2  : [B*kv_len, D]  (key/value source)
    mask : [B, q_len, kv_len], 1.0 => masked
    prob_ref : output ref [B, n_heads, q_len, kv_len]
    returns  : [B*q_len, D]
    """
    # One MXU dot per projection over the whole (flattened) batch.
    q = jnp.dot(q2, wq, preferred_element_type=jnp.float32) + bq      # [B*q_len, HD]
    k = jnp.dot(kv2, wk, preferred_element_type=jnp.float32) + bk     # [B*kv_len, HD]
    v = jnp.dot(kv2, wv, preferred_element_type=jnp.float32) + bv     # [B*kv_len, HD]

    scale = 1.0 / (head_dim ** 0.5)
    ctx_rows = []
    for b in range(batch):                     # static, tiny loops (B=2, H=2)
        qrow = slice(b * q_len, (b + 1) * q_len)
        krow = slice(b * kv_len, (b + 1) * kv_len)
        mb = mask[b]                           # [q_len, kv_len]
        ctx_heads = []
        for h in range(n_heads):
            col = slice(h * head_dim, (h + 1) * head_dim)
            qh = q[qrow, col]                  # [q_len, head_dim]
            kh = k[krow, col]                  # [kv_len, head_dim]
            vh = v[krow, col]                  # [kv_len, head_dim]
            s = jnp.dot(qh, kh.T, preferred_element_type=jnp.float32) * scale
            s = jnp.where(mb > 0, -1e30, s)
            s = s - jnp.max(s, axis=-1, keepdims=True)
            p = jnp.exp(s)
            # EUP reciprocal instead of VALU divide.
            p = p * pl.reciprocal(jnp.sum(p, axis=-1, keepdims=True), approx=True)
            prob_ref[b, h, :, :] = p
            ctx_heads.append(jnp.dot(p, vh, preferred_element_type=jnp.float32))
        ctx_rows.append(jnp.concatenate(ctx_heads, axis=-1))          # [q_len, HD]
    ctx = jnp.concatenate(ctx_rows, axis=0)                           # [B*q_len, HD]

    # Single merged output projection (K = HD) + residual + post-LayerNorm.
    att = jnp.dot(ctx, wo, preferred_element_type=jnp.float32) + bo   # [B*q_len, D]
    return _layernorm(q2 + att, g, beta)


# ----------------------------- fused DecoderBlock kernel -----------------------------
def decoder_block_kernel(tgt_ref, src_ref, tmask_ref, xmask_ref,
                         sa_wq, sa_bq, sa_wk, sa_bk, sa_wv, sa_bv, sa_wo, sa_bo, sa_g, sa_b,
                         ca_wq, ca_bq, ca_wk, ca_bk, ca_wv, ca_bv, ca_wo, ca_bo, ca_g, ca_b,
                         ff_w1, ff_b1, ff_w2, ff_b2, ff_g, ff_b,
                         out_ref, self_prob_ref, inter_prob_ref,
                         *, n_heads, head_dim):
    B, Sq, D = tgt_ref.shape
    Sk = src_ref.shape[1]

    tgt2 = tgt_ref[...].reshape(B * Sq, D)
    src2 = src_ref[...].reshape(B * Sk, D)
    tmask = tmask_ref[...]
    xmask = xmask_ref[...]

    # 1) masked self-attention over tgt (query = key/value = tgt)
    h1 = _mha(tgt2, tgt2, tmask, self_prob_ref,
              sa_wq[...], sa_bq[...], sa_wk[...], sa_bk[...], sa_wv[...], sa_bv[...],
              sa_wo[...], sa_bo[...], sa_g[...], sa_b[...],
              batch=B, q_len=Sq, kv_len=Sq, n_heads=n_heads, head_dim=head_dim)

    # 2) cross-attention (query = self-att output, key/value = src)
    h2 = _mha(h1, src2, xmask, inter_prob_ref,
              ca_wq[...], ca_bq[...], ca_wk[...], ca_bk[...], ca_wv[...], ca_bv[...],
              ca_wo[...], ca_bo[...], ca_g[...], ca_b[...],
              batch=B, q_len=Sq, kv_len=Sk, n_heads=n_heads, head_dim=head_dim)

    # 3) ResidualFF: Linear -> ReLU -> Linear + residual + post-LayerNorm
    ff = jnp.dot(h2, ff_w1[...], preferred_element_type=jnp.float32) + ff_b1[...]
    ff = jnp.maximum(ff, 0.0)
    ff = jnp.dot(ff, ff_w2[...], preferred_element_type=jnp.float32) + ff_b2[...]
    h3 = _layernorm(h2 + ff, ff_g[...], ff_b[...])

    out_ref[...] = h3.reshape(B, Sq, D)


# ----------------------------- wrapper -----------------------------
def decoder_block_forward(params, src, tgt, tgt_mem, tgt_mask, tgt_to_src_mask):
    # TODO(synk): tgt_mem (cached states) concatenation not implemented; mem=None path only.
    assert tgt_mem is None
    B, Sq, D = tgt.shape
    Sk = src.shape[1]
    sa, ca, ff = params["self_att"], params["cross_att"], params["ff"]

    kern = functools.partial(decoder_block_kernel, n_heads=N_HEADS, head_dim=HEAD_DIM)
    out, self_prob, inter_prob = pl.pallas_call(
        kern,
        out_shape=(
            jax.ShapeDtypeStruct((B, Sq, D), jnp.float32),
            jax.ShapeDtypeStruct((B, N_HEADS, Sq, Sq), jnp.float32),
            jax.ShapeDtypeStruct((B, N_HEADS, Sq, Sk), jnp.float32),
        ),
        # no grid / no BlockSpecs: single invocation, every operand whole-array in VMEM
    )(tgt, src, tgt_mask, tgt_to_src_mask,
      sa["wq"], sa["bq"], sa["wk"], sa["bk"], sa["wv"], sa["bv"],
      sa["wo"], sa["bo"], sa["ln_g"], sa["ln_b"],
      ca["wq"], ca["bq"], ca["wk"], ca["bk"], ca["wv"], ca["bv"],
      ca["wo"], ca["bo"], ca["ln_g"], ca["ln_b"],
      ff["w1"], ff["b1"], ff["w2"], ff["b2"], ff["ln_g"], ff["ln_b"])

    new_mem = tgt  # mem cache returned by the self-attention (mem=None case)
    return out, new_mem, self_prob, inter_prob


# ----------------------------- masks (plain-JAX glue) -----------------------------
def build_self_mask(tgt_lens, qs):
    pos = jnp.arange(qs)
    key_pad = pos[None, :] >= tgt_lens[:, None]                # [B, qs]
    causal = jnp.triu(jnp.ones((qs, qs), jnp.bool_), k=1)      # [qs, qs]
    return (key_pad[:, None, :] | causal[None]).astype(jnp.float32)


def build_cross_mask(src_lens, qs, ks):
    pos = jnp.arange(ks)
    key_pad = pos[None, :] >= src_lens[:, None]                # [B, ks]
    return jnp.broadcast_to(key_pad[:, None, :],
                            (src_lens.shape[0], qs, ks)).astype(jnp.float32)


# ----------------------------- deterministic parameter init -----------------------------
def init_params(key):
    def nrm(k, shape, std=0.02):
        return jax.random.normal(k, shape, jnp.float32) * std

    HD = N_HEADS * HEAD_DIM
    ks = jax.random.split(key, 4)

    def att_params(k4):
        k = jax.random.split(k4, 4)
        return {
            "wq": nrm(k[0], (HIDDEN_DIM, HD)), "bq": jnp.zeros((1, HD), jnp.float32),
            "wk": nrm(k[1], (HIDDEN_DIM, HD)), "bk": jnp.zeros((1, HD), jnp.float32),
            "wv": nrm(k[2], (HIDDEN_DIM, HD)), "bv": jnp.zeros((1, HD), jnp.float32),
            "wo": nrm(k[3], (HD, HIDDEN_DIM)), "bo": jnp.zeros((1, HIDDEN_DIM), jnp.float32),
            "ln_g": jnp.ones((1, HIDDEN_DIM), jnp.float32),
            "ln_b": jnp.zeros((1, HIDDEN_DIM), jnp.float32),
        }

    return {
        "self_att": att_params(ks[0]),
        "cross_att": att_params(ks[1]),
        "ff": {
            "w1": nrm(ks[2], (HIDDEN_DIM, PROJECTION_DIM)),
            "b1": jnp.zeros((1, PROJECTION_DIM), jnp.float32),
            "w2": nrm(ks[3], (PROJECTION_DIM, HIDDEN_DIM)),
            "b2": jnp.zeros((1, HIDDEN_DIM), jnp.float32),
            "ln_g": jnp.ones((1, HIDDEN_DIM), jnp.float32),
            "ln_b": jnp.zeros((1, HIDDEN_DIM), jnp.float32),
        },
    }


# ----------------------------- main -----------------------------
if __name__ == "__main__":
    key = jax.random.PRNGKey(0)
    pkey, skey, tkey = jax.random.split(key, 3)
    params = init_params(pkey)

    src = jax.random.normal(skey, (BATCH, SRC_LEN, HIDDEN_DIM), jnp.float32)
    tgt = jax.random.normal(tkey, (BATCH, TGT_LEN, HIDDEN_DIM), jnp.float32)

    tgt_lens = jnp.array([TGT_LEN, TGT_LEN - 2], dtype=jnp.int32)
    src_lens = jnp.array([SRC_LEN, SRC_LEN - 5], dtype=jnp.int32)
    tgt_mask = build_self_mask(tgt_lens, TGT_LEN)                     # [B, Sq, Sq]
    tgt_to_src_mask = build_cross_mask(src_lens, TGT_LEN, SRC_LEN)    # [B, Sq, Sk]

    out, new_mem, self_prob, inter_prob = decoder_block_forward(
        params, src, tgt, None, tgt_mask, tgt_to_src_mask)
    out = jax.block_until_ready(out)

    assert out.shape == (BATCH, TGT_LEN, HIDDEN_DIM)
    assert new_mem.shape == tgt.shape
    assert self_prob.shape == (BATCH, N_HEADS, TGT_LEN, TGT_LEN)
    assert inter_prob.shape == (BATCH, N_HEADS, TGT_LEN, SRC_LEN)
    assert bool(jnp.all(jnp.isfinite(out)))
    assert bool(jnp.all(jnp.isfinite(self_prob)))
    assert bool(jnp.all(jnp.isfinite(inter_prob)))
    print("KERNEL_OK")
</pallas_src>

<mosaic_0001>
module attributes {stable_mosaic.version = 11 : i64} {
  func.func @decoder_block_kernel(%arg0: memref<2x8x32xf32, #tpu.memory_space<vmem>>, %arg1: memref<2x16x32xf32, #tpu.memory_space<vmem>>, %arg2: memref<2x8x8xf32, #tpu.memory_space<vmem>>, %arg3: memref<2x8x16xf32, #tpu.memory_space<vmem>>, %arg4: memref<32x32xf32, #tpu.memory_space<vmem>>, %arg5: memref<1x32xf32, #tpu.memory_space<vmem>>, %arg6: memref<32x32xf32, #tpu.memory_space<vmem>>, %arg7: memref<1x32xf32, #tpu.memory_space<vmem>>, %arg8: memref<32x32xf32, #tpu.memory_space<vmem>>, %arg9: memref<1x32xf32, #tpu.memory_space<vmem>>, %arg10: memref<32x32xf32, #tpu.memory_space<vmem>>, %arg11: memref<1x32xf32, #tpu.memory_space<vmem>>, %arg12: memref<1x32xf32, #tpu.memory_space<vmem>>, %arg13: memref<1x32xf32, #tpu.memory_space<vmem>>, %arg14: memref<32x32xf32, #tpu.memory_space<vmem>>, %arg15: memref<1x32xf32, #tpu.memory_space<vmem>>, %arg16: memref<32x32xf32, #tpu.memory_space<vmem>>, %arg17: memref<1x32xf32, #tpu.memory_space<vmem>>, %arg18: memref<32x32xf32, #tpu.memory_space<vmem>>, %arg19: memref<1x32xf32, #tpu.memory_space<vmem>>, %arg20: memref<32x32xf32, #tpu.memory_space<vmem>>, %arg21: memref<1x32xf32, #tpu.memory_space<vmem>>, %arg22: memref<1x32xf32, #tpu.memory_space<vmem>>, %arg23: memref<1x32xf32, #tpu.memory_space<vmem>>, %arg24: memref<32x64xf32, #tpu.memory_space<vmem>>, %arg25: memref<1x64xf32, #tpu.memory_space<vmem>>, %arg26: memref<64x32xf32, #tpu.memory_space<vmem>>, %arg27: memref<1x32xf32, #tpu.memory_space<vmem>>, %arg28: memref<1x32xf32, #tpu.memory_space<vmem>>, %arg29: memref<1x32xf32, #tpu.memory_space<vmem>>, %arg30: memref<2x8x32xf32, #tpu.memory_space<vmem>>, %arg31: memref<2x2x8x8xf32, #tpu.memory_space<vmem>>, %arg32: memref<2x2x8x16xf32, #tpu.memory_space<vmem>>) attributes {dimension_semantics = [], scalar_prefetch = 0 : i64, scratch_operands = 0 : i64, tpu.core_type = #tpu.core_type<tc>} {
    %c0 = arith.constant 0 : index
    %c0_0 = arith.constant 0 : index
    %c0_1 = arith.constant 0 : index
    %0 = vector.load %arg0[%c0, %c0_0, %c0_1] : memref<2x8x32xf32, #tpu.memory_space<vmem>>, vector<2x8x32xf32>
    %1 = vector.shape_cast %0 : vector<2x8x32xf32> to vector<16x32xf32>
    %c0_2 = arith.constant 0 : index
    %c0_3 = arith.constant 0 : index
    %c0_4 = arith.constant 0 : index
    %2 = vector.load %arg1[%c0_2, %c0_3, %c0_4] : memref<2x16x32xf32, #tpu.memory_space<vmem>>, vector<2x16x32xf32>
    %3 = vector.shape_cast %2 : vector<2x16x32xf32> to vector<32x32xf32>
    %c0_5 = arith.constant 0 : index
    %c0_6 = arith.constant 0 : index
    %c0_7 = arith.constant 0 : index
    %4 = vector.load %arg2[%c0_5, %c0_6, %c0_7] : memref<2x8x8xf32, #tpu.memory_space<vmem>>, vector<2x8x8xf32>
    %c0_8 = arith.constant 0 : index
    %c0_9 = arith.constant 0 : index
    %c0_10 = arith.constant 0 : index
    %5 = vector.load %arg3[%c0_8, %c0_9, %c0_10] : memref<2x8x16xf32, #tpu.memory_space<vmem>>, vector<2x8x16xf32>
    %c0_11 = arith.constant 0 : index
    %c0_12 = arith.constant 0 : index
    %6 = vector.load %arg4[%c0_11, %c0_12] : memref<32x32xf32, #tpu.memory_space<vmem>>, vector<32x32xf32>
    %c0_13 = arith.constant 0 : index
    %c0_14 = arith.constant 0 : index
    %7 = vector.load %arg5[%c0_13, %c0_14] : memref<1x32xf32, #tpu.memory_space<vmem>>, vector<1x32xf32>
    %c0_15 = arith.constant 0 : index
    %c0_16 = arith.constant 0 : index
    %8 = vector.load %arg6[%c0_15, %c0_16] : memref<32x32xf32, #tpu.memory_space<vmem>>, vector<32x32xf32>
    %c0_17 = arith.constant 0 : index
    %c0_18 = arith.constant 0 : index
    %9 = vector.load %arg7[%c0_17, %c0_18] : memref<1x32xf32, #tpu.memory_space<vmem>>, vector<1x32xf32>
    %c0_19 = arith.constant 0 : index
    %c0_20 = arith.constant 0 : index
    %10 = vector.load %arg8[%c0_19, %c0_20] : memref<32x32xf32, #tpu.memory_space<vmem>>, vector<32x32xf32>
    %c0_21 = arith.constant 0 : index
    %c0_22 = arith.constant 0 : index
    %11 = vector.load %arg9[%c0_21, %c0_22] : memref<1x32xf32, #tpu.memory_space<vmem>>, vector<1x32xf32>
    %c0_23 = arith.constant 0 : index
    %c0_24 = arith.constant 0 : index
    %12 = vector.load %arg10[%c0_23, %c0_24] : memref<32x32xf32, #tpu.memory_space<vmem>>, vector<32x32xf32>
    %c0_25 = arith.constant 0 : index
    %c0_26 = arith.constant 0 : index
    %13 = vector.load %arg11[%c0_25, %c0_26] : memref<1x32xf32, #tpu.memory_space<vmem>>, vector<1x32xf32>
    %c0_27 = arith.constant 0 : index
    %c0_28 = arith.constant 0 : index
    %14 = vector.load %arg12[%c0_27, %c0_28] : memref<1x32xf32, #tpu.memory_space<vmem>>, vector<1x32xf32>
    %c0_29 = arith.constant 0 : index
    %c0_30 = arith.constant 0 : index
    %15 = vector.load %arg13[%c0_29, %c0_30] : memref<1x32xf32, #tpu.memory_space<vmem>>, vector<1x32xf32>
    %cst = arith.constant dense<0.000000e+00> : vector<16x32xf32>
    %16 = tpu.matmul %1, %6, %cst {dimension_numbers = #tpu.dot_dimension_numbers<[1], [0], [0], [1], [0, 0, 1, 1], [], []>} : vector<16x32xf32>, vector<32x32xf32>, vector<16x32xf32> -> vector<16x32xf32>
    %17 = vector.broadcast %7 : vector<1x32xf32> to vector<16x32xf32>
    %18 = arith.addf %16, %17 : vector<16x32xf32>
    %cst_31 = arith.constant dense<0.000000e+00> : vector<16x32xf32>
    %19 = tpu.matmul %1, %8, %cst_31 {dimension_numbers = #tpu.dot_dimension_numbers<[1], [0], [0], [1], [0, 0, 1, 1], [], []>} : vector<16x32xf32>, vector<32x32xf32>, vector<16x32xf32> -> vector<16x32xf32>
    %20 = vector.broadcast %9 : vector<1x32xf32> to vector<16x32xf32>
    %21 = arith.addf %19, %20 : vector<16x32xf32>
    %cst_32 = arith.constant dense<0.000000e+00> : vector<16x32xf32>
    %22 = tpu.matmul %1, %10, %cst_32 {dimension_numbers = #tpu.dot_dimension_numbers<[1], [0], [0], [1], [0, 0, 1, 1], [], []>} : vector<16x32xf32>, vector<32x32xf32>, vector<16x32xf32> -> vector<16x32xf32>
    %23 = vector.broadcast %11 : vector<1x32xf32> to vector<16x32xf32>
    %24 = arith.addf %22, %23 : vector<16x32xf32>
    %25 = vector.extract_strided_slice %4 {offsets = [0, 0, 0], sizes = [1, 8, 8], strides = [1, 1, 1]} : vector<2x8x8xf32> to vector<1x8x8xf32>
    %26 = vector.shape_cast %25 : vector<1x8x8xf32> to vector<8x8xf32>
    %27 = vector.extract_strided_slice %18 {offsets = [0, 0], sizes = [8, 16], strides = [1, 1]} : vector<16x32xf32> to vector<8x16xf32>
    %28 = vector.extract_strided_slice %21 {offsets = [0, 0], sizes = [8, 16], strides = [1, 1]} : vector<16x32xf32> to vector<8x16xf32>
    %29 = vector.extract_strided_slice %24 {offsets = [0, 0], sizes = [8, 16], strides = [1, 1]} : vector<16x32xf32> to vector<8x16xf32>
    %30 = tpu.transpose %28, [1, 0] : vector<8x16xf32> -> vector<16x8xf32>
    %cst_33 = arith.constant dense<0.000000e+00> : vector<8x8xf32>
    %31 = tpu.matmul %27, %30, %cst_33 {dimension_numbers = #tpu.dot_dimension_numbers<[1], [0], [0], [1], [0, 0, 1, 1], [], []>} : vector<8x16xf32>, vector<16x8xf32>, vector<8x8xf32> -> vector<8x8xf32>
    %cst_34 = arith.constant 2.500000e-01 : f32
    %32 = vector.broadcast %cst_34 : f32 to vector<8x8xf32>
    %33 = arith.mulf %31, %32 : vector<8x8xf32>
    %cst_35 = arith.constant 0.000000e+00 : f32
    %34 = vector.broadcast %cst_35 : f32 to vector<8x8xf32>
    %35 = arith.cmpf ogt, %26, %34 : vector<8x8xf32>
    %cst_36 = arith.constant -1.000000e+30 : f32
    %36 = vector.broadcast %cst_36 : f32 to vector<8x8xf32>
    %37 = arith.select %35, %36, %33 : vector<8x8xi1>, vector<8x8xf32>
    %cst_37 = arith.constant dense<0xFF800000> : vector<8xf32>
    %38 = vector.multi_reduction <maximumf>, %37, %cst_37 [1] : vector<8x8xf32> to vector<8xf32>
    %39 = vector.shape_cast %38 : vector<8xf32> to vector<8x1xf32>
    %40 = vector.broadcast %39 : vector<8x1xf32> to vector<8x8xf32>
    %41 = arith.subf %37, %40 : vector<8x8xf32>
    %42 = math.exp %41 : vector<8x8xf32>
    %cst_38 = arith.constant dense<0.000000e+00> : vector<8xf32>
    %43 = vector.multi_reduction <add>, %42, %cst_38 [1] : vector<8x8xf32> to vector<8xf32>
    %44 = vector.shape_cast %43 : vector<8xf32> to vector<8x1xf32>
    %45 = tpu.reciprocal %44 {approx = true} : vector<8x1xf32> -> vector<8x1xf32>
    %46 = vector.broadcast %45 : vector<8x1xf32> to vector<8x8xf32>
    %47 = arith.mulf %42, %46 : vector<8x8xf32>
    %c0_39 = arith.constant 0 : index
    %c0_40 = arith.constant 0 : index
    %c0_41 = arith.constant 0 : index
    %c0_42 = arith.constant 0 : index
    %48 = vector.load %arg31[%c0_39, %c0_40, %c0_41, %c0_42] : memref<2x2x8x8xf32, #tpu.memory_space<vmem>>, vector<1x1x8x8xf32>
    %49 = vector.shape_cast %48 : vector<1x1x8x8xf32> to vector<8x8xf32>
    %50 = vector.shape_cast %47 : vector<8x8xf32> to vector<1x1x8x8xf32>
    tpu.vector_store %arg31[%c0_39, %c0_40, %c0_41, %c0_42], %50 {strides = array<i32>} : memref<2x2x8x8xf32, #tpu.memory_space<vmem>>, vector<1x1x8x8xf32>,
    %cst_43 = arith.constant dense<0.000000e+00> : vector<8x16xf32>
    %51 = tpu.matmul %47, %29, %cst_43 {dimension_numbers = #tpu.dot_dimension_numbers<[1], [0], [0], [1], [0, 0, 1, 1], [], []>} : vector<8x8xf32>, vector<8x16xf32>, vector<8x16xf32> -> vector<8x16xf32>
    %52 = vector.extract_strided_slice %18 {offsets = [0, 16], sizes = [8, 16], strides = [1, 1]} : vector<16x32xf32> to vector<8x16xf32>
    %53 = vector.extract_strided_slice %21 {offsets = [0, 16], sizes = [8, 16], strides = [1, 1]} : vector<16x32xf32> to vector<8x16xf32>
    %54 = vector.extract_strided_slice %24 {offsets = [0, 16], sizes = [8, 16], strides = [1, 1]} : vector<16x32xf32> to vector<8x16xf32>
    %55 = tpu.transpose %53, [1, 0] : vector<8x16xf32> -> vector<16x8xf32>
    %cst_44 = arith.constant dense<0.000000e+00> : vector<8x8xf32>
    %56 = tpu.matmul %52, %55, %cst_44 {dimension_numbers = #tpu.dot_dimension_numbers<[1], [0], [0], [1], [0, 0, 1, 1], [], []>} : vector<8x16xf32>, vector<16x8xf32>, vector<8x8xf32> -> vector<8x8xf32>
    %cst_45 = arith.constant 2.500000e-01 : f32
    %57 = vector.broadcast %cst_45 : f32 to vector<8x8xf32>
    %58 = arith.mulf %56, %57 : vector<8x8xf32>
    %cst_46 = arith.constant 0.000000e+00 : f32
    %59 = vector.broadcast %cst_46 : f32 to vector<8x8xf32>
    %60 = arith.cmpf ogt, %26, %59 : vector<8x8xf32>
    %cst_47 = arith.constant -1.000000e+30 : f32
    %61 = vector.broadcast %cst_47 : f32 to vector<8x8xf32>
    %62 = arith.select %60, %61, %58 : vector<8x8xi1>, vector<8x8xf32>
    %cst_48 = arith.constant dense<0xFF800000> : vector<8xf32>
    %63 = vector.multi_reduction <maximumf>, %62, %cst_48 [1] : vector<8x8xf32> to vector<8xf32>
    %64 = vector.shape_cast %63 : vector<8xf32> to vector<8x1xf32>
    %65 = vector.broadcast %64 : vector<8x1xf32> to vector<8x8xf32>
    %66 = arith.subf %62, %65 : vector<8x8xf32>
    %67 = math.exp %66 : vector<8x8xf32>
    %cst_49 = arith.constant dense<0.000000e+00> : vector<8xf32>
    %68 = vector.multi_reduction <add>, %67, %cst_49 [1] : vector<8x8xf32> to vector<8xf32>
    %69 = vector.shape_cast %68 : vector<8xf32> to vector<8x1xf32>
    %70 = tpu.reciprocal %69 {approx = true} : vector<8x1xf32> -> vector<8x1xf32>
    %71 = vector.broadcast %70 : vector<8x1xf32> to vector<8x8xf32>
    %72 = arith.mulf %67, %71 : vector<8x8xf32>
    %c0_50 = arith.constant 0 : index
    %c1 = arith.constant 1 : index
    %c0_51 = arith.constant 0 : index
    %c0_52 = arith.constant 0 : index
    %73 = vector.load %arg31[%c0_50, %c1, %c0_51, %c0_52] : memref<2x2x8x8xf32, #tpu.memory_space<vmem>>, vector<1x1x8x8xf32>
    %74 = vector.shape_cast %73 : vector<1x1x8x8xf32> to vector<8x8xf32>
    %75 = vector.shape_cast %72 : vector<8x8xf32> to vector<1x1x8x8xf32>
    tpu.vector_store %arg31[%c0_50, %c1, %c0_51, %c0_52], %75 {strides = array<i32>} : memref<2x2x8x8xf32, #tpu.memory_space<vmem>>, vector<1x1x8x8xf32>,
    %cst_53 = arith.constant dense<0.000000e+00> : vector<8x16xf32>
    %76 = tpu.matmul %72, %54, %cst_53 {dimension_numbers = #tpu.dot_dimension_numbers<[1], [0], [0], [1], [0, 0, 1, 1], [], []>} : vector<8x8xf32>, vector<8x16xf32>, vector<8x16xf32> -> vector<8x16xf32>
    %77 = tpu.concatenate %51, %76 in 1 : vector<8x16xf32>, vector<8x16xf32> -> vector<8x32xf32>
    %78 = vector.extract_strided_slice %4 {offsets = [1, 0, 0], sizes = [1, 8, 8], strides = [1, 1, 1]} : vector<2x8x8xf32> to vector<1x8x8xf32>
    %79 = vector.shape_cast %78 : vector<1x8x8xf32> to vector<8x8xf32>
    %80 = vector.extract_strided_slice %18 {offsets = [8, 0], sizes = [8, 16], strides = [1, 1]} : vector<16x32xf32> to vector<8x16xf32>
    %81 = vector.extract_strided_slice %21 {offsets = [8, 0], sizes = [8, 16], strides = [1, 1]} : vector<16x32xf32> to vector<8x16xf32>
    %82 = vector.extract_strided_slice %24 {offsets = [8, 0], sizes = [8, 16], strides = [1, 1]} : vector<16x32xf32> to vector<8x16xf32>
    %83 = tpu.transpose %81, [1, 0] : vector<8x16xf32> -> vector<16x8xf32>
    %cst_54 = arith.constant dense<0.000000e+00> : vector<8x8xf32>
    %84 = tpu.matmul %80, %83, %cst_54 {dimension_numbers = #tpu.dot_dimension_numbers<[1], [0], [0], [1], [0, 0, 1, 1], [], []>} : vector<8x16xf32>, vector<16x8xf32>, vector<8x8xf32> -> vector<8x8xf32>
    %cst_55 = arith.constant 2.500000e-01 : f32
    %85 = vector.broadcast %cst_55 : f32 to vector<8x8xf32>
    %86 = arith.mulf %84, %85 : vector<8x8xf32>
    %cst_56 = arith.constant 0.000000e+00 : f32
    %87 = vector.broadcast %cst_56 : f32 to vector<8x8xf32>
    %88 = arith.cmpf ogt, %79, %87 : vector<8x8xf32>
    %cst_57 = arith.constant -1.000000e+30 : f32
    %89 = vector.broadcast %cst_57 : f32 to vector<8x8xf32>
    %90 = arith.select %88, %89, %86 : vector<8x8xi1>, vector<8x8xf32>
    %cst_58 = arith.constant dense<0xFF800000> : vector<8xf32>
    %91 = vector.multi_reduction <maximumf>, %90, %cst_58 [1] : vector<8x8xf32> to vector<8xf32>
    %92 = vector.shape_cast %91 : vector<8xf32> to vector<8x1xf32>
    %93 = vector.broadcast %92 : vector<8x1xf32> to vector<8x8xf32>
    %94 = arith.subf %90, %93 : vector<8x8xf32>
    %95 = math.exp %94 : vector<8x8xf32>
    %cst_59 = arith.constant dense<0.000000e+00> : vector<8xf32>
    %96 = vector.multi_reduction <add>, %95, %cst_59 [1] : vector<8x8xf32> to vector<8xf32>
    %97 = vector.shape_cast %96 : vector<8xf32> to vector<8x1xf32>
    %98 = tpu.reciprocal %97 {approx = true} : vector<8x1xf32> -> vector<8x1xf32>
    %99 = vector.broadcast %98 : vector<8x1xf32> to vector<8x8xf32>
    %100 = arith.mulf %95, %99 : vector<8x8xf32>
    %c1_60 = arith.constant 1 : index
    %c0_61 = arith.constant 0 : index
    %c0_62 = arith.constant 0 : index
    %c0_63 = arith.constant 0 : index
    %101 = vector.load %arg31[%c1_60, %c0_61, %c0_62, %c0_63] : memref<2x2x8x8xf32, #tpu.memory_space<vmem>>, vector<1x1x8x8xf32>
    %102 = vector.shape_cast %101 : vector<1x1x8x8xf32> to vector<8x8xf32>
    %103 = vector.shape_cast %100 : vector<8x8xf32> to vector<1x1x8x8xf32>
    tpu.vector_store %arg31[%c1_60, %c0_61, %c0_62, %c0_63], %103 {strides = array<i32>} : memref<2x2x8x8xf32, #tpu.memory_space<vmem>>, vector<1x1x8x8xf32>,
    %cst_64 = arith.constant dense<0.000000e+00> : vector<8x16xf32>
    %104 = tpu.matmul %100, %82, %cst_64 {dimension_numbers = #tpu.dot_dimension_numbers<[1], [0], [0], [1], [0, 0, 1, 1], [], []>} : vector<8x8xf32>, vector<8x16xf32>, vector<8x16xf32> -> vector<8x16xf32>
    %105 = vector.extract_strided_slice %18 {offsets = [8, 16], sizes = [8, 16], strides = [1, 1]} : vector<16x32xf32> to vector<8x16xf32>
    %106 = vector.extract_strided_slice %21 {offsets = [8, 16], sizes = [8, 16], strides = [1, 1]} : vector<16x32xf32> to vector<8x16xf32>
    %107 = vector.extract_strided_slice %24 {offsets = [8, 16], sizes = [8, 16], strides = [1, 1]} : vector<16x32xf32> to vector<8x16xf32>
    %108 = tpu.transpose %106, [1, 0] : vector<8x16xf32> -> vector<16x8xf32>
    %cst_65 = arith.constant dense<0.000000e+00> : vector<8x8xf32>
    %109 = tpu.matmul %105, %108, %cst_65 {dimension_numbers = #tpu.dot_dimension_numbers<[1], [0], [0], [1], [0, 0, 1, 1], [], []>} : vector<8x16xf32>, vector<16x8xf32>, vector<8x8xf32> -> vector<8x8xf32>
    %cst_66 = arith.constant 2.500000e-01 : f32
    %110 = vector.broadcast %cst_66 : f32 to vector<8x8xf32>
    %111 = arith.mulf %109, %110 : vector<8x8xf32>
    %cst_67 = arith.constant 0.000000e+00 : f32
    %112 = vector.broadcast %cst_67 : f32 to vector<8x8xf32>
    %113 = arith.cmpf ogt, %79, %112 : vector<8x8xf32>
    %cst_68 = arith.constant -1.000000e+30 : f32
    %114 = vector.broadcast %cst_68 : f32 to vector<8x8xf32>
    %115 = arith.select %113, %114, %111 : vector<8x8xi1>, vector<8x8xf32>
    %cst_69 = arith.constant dense<0xFF800000> : vector<8xf32>
    %116 = vector.multi_reduction <maximumf>, %115, %cst_69 [1] : vector<8x8xf32> to vector<8xf32>
    %117 = vector.shape_cast %116 : vector<8xf32> to vector<8x1xf32>
    %118 = vector.broadcast %117 : vector<8x1xf32> to vector<8x8xf32>
    %119 = arith.subf %115, %118 : vector<8x8xf32>
    %120 = math.exp %119 : vector<8x8xf32>
    %cst_70 = arith.constant dense<0.000000e+00> : vector<8xf32>
    %121 = vector.multi_reduction <add>, %120, %cst_70 [1] : vector<8x8xf32> to vector<8xf32>
    %122 = vector.shape_cast %121 : vector<8xf32> to vector<8x1xf32>
    %123 = tpu.reciprocal %122 {approx = true} : vector<8x1xf32> -> vector<8x1xf32>
    %124 = vector.broadcast %123 : vector<8x1xf32> to vector<8x8xf32>
    %125 = arith.mulf %120, %124 : vector<8x8xf32>
    %c1_71 = arith.constant 1 : index
    %c1_72 = arith.constant 1 : index
    %c0_73 = arith.constant 0 : index
    %c0_74 = arith.constant 0 : index
    %126 = vector.load %arg31[%c1_71, %c1_72, %c0_73, %c0_74] : memref<2x2x8x8xf32, #tpu.memory_space<vmem>>, vector<1x1x8x8xf32>
    %127 = vector.shape_cast %126 : vector<1x1x8x8xf32> to vector<8x8xf32>
    %128 = vector.shape_cast %125 : vector<8x8xf32> to vector<1x1x8x8xf32>
    tpu.vector_store %arg31[%c1_71, %c1_72, %c0_73, %c0_74], %128 {strides = array<i32>} : memref<2x2x8x8xf32, #tpu.memory_space<vmem>>, vector<1x1x8x8xf32>,
    %cst_75 = arith.constant dense<0.000000e+00> : vector<8x16xf32>
    %129 = tpu.matmul %125, %107, %cst_75 {dimension_numbers = #tpu.dot_dimension_numbers<[1], [0], [0], [1], [0, 0, 1, 1], [], []>} : vector<8x8xf32>, vector<8x16xf32>, vector<8x16xf32> -> vector<8x16xf32>
    %130 = tpu.concatenate %104, %129 in 1 : vector<8x16xf32>, vector<8x16xf32> -> vector<8x32xf32>
    %131 = tpu.concatenate %77, %130 in 0 : vector<8x32xf32>, vector<8x32xf32> -> vector<16x32xf32>
    %cst_76 = arith.constant dense<0.000000e+00> : vector<16x32xf32>
    %132 = tpu.matmul %131, %12, %cst_76 {dimension_numbers = #tpu.dot_dimension_numbers<[1], [0], [0], [1], [0, 0, 1, 1], [], []>} : vector<16x32xf32>, vector<32x32xf32>, vector<16x32xf32> -> vector<16x32xf32>
    %133 = vector.broadcast %13 : vector<1x32xf32> to vector<16x32xf32>
    %134 = arith.addf %132, %133 : vector<16x32xf32>
    %135 = arith.addf %1, %134 : vector<16x32xf32>
    %cst_77 = arith.constant dense<0.000000e+00> : vector<16xf32>
    %136 = vector.multi_reduction <add>, %135, %cst_77 [1] : vector<16x32xf32> to vector<16xf32>
    %137 = vector.shape_cast %136 : vector<16xf32> to vector<16x1xf32>
    %cst_78 = arith.constant 3.200000e+01 : f32
    %138 = vector.broadcast %cst_78 : f32 to vector<16x1xf32>
    %139 = arith.divf %137, %138 : vector<16x1xf32>
    %140 = vector.broadcast %139 : vector<16x1xf32> to vector<16x32xf32>
    %141 = arith.subf %135, %140 : vector<16x32xf32>
    %142 = arith.mulf %141, %141 : vector<16x32xf32>
    %cst_79 = arith.constant dense<0.000000e+00> : vector<16xf32>
    %143 = vector.multi_reduction <add>, %142, %cst_79 [1] : vector<16x32xf32> to vector<16xf32>
    %144 = vector.shape_cast %143 : vector<16xf32> to vector<16x1xf32>
    %cst_80 = arith.constant 3.200000e+01 : f32
    %145 = vector.broadcast %cst_80 : f32 to vector<16x1xf32>
    %146 = arith.divf %144, %145 : vector<16x1xf32>
    %147 = vector.broadcast %139 : vector<16x1xf32> to vector<16x32xf32>
    %148 = arith.subf %135, %147 : vector<16x32xf32>
    %cst_81 = arith.constant 9.99999974E-6 : f32
    %149 = vector.broadcast %cst_81 : f32 to vector<16x1xf32>
    %150 = arith.addf %146, %149 : vector<16x1xf32>
    %151 = math.rsqrt %150 : vector<16x1xf32>
    %152 = vector.broadcast %151 : vector<16x1xf32> to vector<16x32xf32>
    %153 = arith.mulf %148, %152 : vector<16x32xf32>
    %154 = vector.broadcast %14 : vector<1x32xf32> to vector<16x32xf32>
    %155 = arith.mulf %153, %154 : vector<16x32xf32>
    %156 = vector.broadcast %15 : vector<1x32xf32> to vector<16x32xf32>
    %157 = arith.addf %155, %156 : vector<16x32xf32>
    %c0_82 = arith.constant 0 : index
    %c0_83 = arith.constant 0 : index
    %158 = vector.load %arg14[%c0_82, %c0_83] : memref<32x32xf32, #tpu.memory_space<vmem>>, vector<32x32xf32>
    %c0_84 = arith.constant 0 : index
    %c0_85 = arith.constant 0 : index
    %159 = vector.load %arg15[%c0_84, %c0_85] : memref<1x32xf32, #tpu.memory_space<vmem>>, vector<1x32xf32>
    %c0_86 = arith.constant 0 : index
    %c0_87 = arith.constant 0 : index
    %160 = vector.load %arg16[%c0_86, %c0_87] : memref<32x32xf32, #tpu.memory_space<vmem>>, vector<32x32xf32>
    %c0_88 = arith.constant 0 : index
    %c0_89 = arith.constant 0 : index
    %161 = vector.load %arg17[%c0_88, %c0_89] : memref<1x32xf32, #tpu.memory_space<vmem>>, vector<1x32xf32>
    %c0_90 = arith.constant 0 : index
    %c0_91 = arith.constant 0 : index
    %162 = vector.load %arg18[%c0_90, %c0_91] : memref<32x32xf32, #tpu.memory_space<vmem>>, vector<32x32xf32>
    %c0_92 = arith.constant 0 : index
    %c0_93 = arith.constant 0 : index
    %163 = vector.load %arg19[%c0_92, %c0_93] : memref<1x32xf32, #tpu.memory_space<vmem>>, vector<1x32xf32>
    %c0_94 = arith.constant 0 : index
    %c0_95 = arith.constant 0 : index
    %164 = vector.load %arg20[%c0_94, %c0_95] : memref<32x32xf32, #tpu.memory_space<vmem>>, vector<32x32xf32>
    %c0_96 = arith.constant 0 : index
    %c0_97 = arith.constant 0 : index
    %165 = vector.load %arg21[%c0_96, %c0_97] : memref<1x32xf32, #tpu.memory_space<vmem>>, vector<1x32xf32>
    %c0_98 = arith.constant 0 : index
    %c0_99 = arith.constant 0 : index
    %166 = vector.load %arg22[%c0_98, %c0_99] : memref<1x32xf32, #tpu.memory_space<vmem>>, vector<1x32xf32>
    %c0_100 = arith.constant 0 : index
    %c0_101 = arith.constant 0 : index
    %167 = vector.load %arg23[%c0_100, %c0_101] : memref<1x32xf32, #tpu.memory_space<vmem>>, vector<1x32xf32>
    %cst_102 = arith.constant dense<0.000000e+00> : vector<16x32xf32>
    %168 = tpu.matmul %157, %158, %cst_102 {dimension_numbers = #tpu.dot_dimension_numbers<[1], [0], [0], [1], [0, 0, 1, 1], [], []>} : vector<16x32xf32>, vector<32x32xf32>, vector<16x32xf32> -> vector<16x32xf32>
    %169 = vector.broadcast %159 : vector<1x32xf32> to vector<16x32xf32>
    %170 = arith.addf %168, %169 : vector<16x32xf32>
    %cst_103 = arith.constant dense<0.000000e+00> : vector<32x32xf32>
    %171 = tpu.matmul %3, %160, %cst_103 {dimension_numbers = #tpu.dot_dimension_numbers<[1], [0], [0], [1], [0, 0, 1, 1], [], []>} : vector<32x32xf32>, vector<32x32xf32>, vector<32x32xf32> -> vector<32x32xf32>
    %172 = vector.broadcast %161 : vector<1x32xf32> to vector<32x32xf32>
    %173 = arith.addf %171, %172 : vector<32x32xf32>
    %cst_104 = arith.constant dense<0.000000e+00> : vector<32x32xf32>
    %174 = tpu.matmul %3, %162, %cst_104 {dimension_numbers = #tpu.dot_dimension_numbers<[1], [0], [0], [1], [0, 0, 1, 1], [], []>} : vector<32x32xf32>, vector<32x32xf32>, vector<32x32xf32> -> vector<32x32xf32>
    %175 = vector.broadcast %163 : vector<1x32xf32> to vector<32x32xf32>
    %176 = arith.addf %174, %175 : vector<32x32xf32>
    %177 = vector.extract_strided_slice %5 {offsets = [0, 0, 0], sizes = [1, 8, 16], strides = [1, 1, 1]} : vector<2x8x16xf32> to vector<1x8x16xf32>
    %178 = vector.shape_cast %177 : vector<1x8x16xf32> to vector<8x16xf32>
    %179 = vector.extract_strided_slice %170 {offsets = [0, 0], sizes = [8, 16], strides = [1, 1]} : vector<16x32xf32> to vector<8x16xf32>
    %180 = vector.extract_strided_slice %173 {offsets = [0, 0], sizes = [16, 16], strides = [1, 1]} : vector<32x32xf32> to vector<16x16xf32>
    %181 = vector.extract_strided_slice %176 {offsets = [0, 0], sizes = [16, 16], strides = [1, 1]} : vector<32x32xf32> to vector<16x16xf32>
    %182 = tpu.transpose %180, [1, 0] : vector<16x16xf32> -> vector<16x16xf32>
    %cst_105 = arith.constant dense<0.000000e+00> : vector<8x16xf32>
    %183 = tpu.matmul %179, %182, %cst_105 {dimension_numbers = #tpu.dot_dimension_numbers<[1], [0], [0], [1], [0, 0, 1, 1], [], []>} : vector<8x16xf32>, vector<16x16xf32>, vector<8x16xf32> -> vector<8x16xf32>
    %cst_106 = arith.constant 2.500000e-01 : f32
    %184 = vector.broadcast %cst_106 : f32 to vector<8x16xf32>
    %185 = arith.mulf %183, %184 : vector<8x16xf32>
    %cst_107 = arith.constant 0.000000e+00 : f32
    %186 = vector.broadcast %cst_107 : f32 to vector<8x16xf32>
    %187 = arith.cmpf ogt, %178, %186 : vector<8x16xf32>
    %cst_108 = arith.constant -1.000000e+30 : f32
    %188 = vector.broadcast %cst_108 : f32 to vector<8x16xf32>
    %189 = arith.select %187, %188, %185 : vector<8x16xi1>, vector<8x16xf32>
    %cst_109 = arith.constant dense<0xFF800000> : vector<8xf32>
    %190 = vector.multi_reduction <maximumf>, %189, %cst_109 [1] : vector<8x16xf32> to vector<8xf32>
    %191 = vector.shape_cast %190 : vector<8xf32> to vector<8x1xf32>
    %192 = vector.broadcast %191 : vector<8x1xf32> to vector<8x16xf32>
    %193 = arith.subf %189, %192 : vector<8x16xf32>
    %194 = math.exp %193 : vector<8x16xf32>
    %cst_110 = arith.constant dense<0.000000e+00> : vector<8xf32>
    %195 = vector.multi_reduction <add>, %194, %cst_110 [1] : vector<8x16xf32> to vector<8xf32>
    %196 = vector.shape_cast %195 : vector<8xf32> to vector<8x1xf32>
    %197 = tpu.reciprocal %196 {approx = true} : vector<8x1xf32> -> vector<8x1xf32>
    %198 = vector.broadcast %197 : vector<8x1xf32> to vector<8x16xf32>
    %199 = arith.mulf %194, %198 : vector<8x16xf32>
    %c0_111 = arith.constant 0 : index
    %c0_112 = arith.constant 0 : index
    %c0_113 = arith.constant 0 : index
    %c0_114 = arith.constant 0 : index
    %200 = vector.load %arg32[%c0_111, %c0_112, %c0_113, %c0_114] : memref<2x2x8x16xf32, #tpu.memory_space<vmem>>, vector<1x1x8x16xf32>
    %201 = vector.shape_cast %200 : vector<1x1x8x16xf32> to vector<8x16xf32>
    %202 = vector.shape_cast %199 : vector<8x16xf32> to vector<1x1x8x16xf32>
    tpu.vector_store %arg32[%c0_111, %c0_112, %c0_113, %c0_114], %202 {strides = array<i32>} : memref<2x2x8x16xf32, #tpu.memory_space<vmem>>, vector<1x1x8x16xf32>,
    %cst_115 = arith.constant dense<0.000000e+00> : vector<8x16xf32>
    %203 = tpu.matmul %199, %181, %cst_115 {dimension_numbers = #tpu.dot_dimension_numbers<[1], [0], [0], [1], [0, 0, 1, 1], [], []>} : vector<8x16xf32>, vector<16x16xf32>, vector<8x16xf32> -> vector<8x16xf32>
    %204 = vector.extract_strided_slice %170 {offsets = [0, 16], sizes = [8, 16], strides = [1, 1]} : vector<16x32xf32> to vector<8x16xf32>
    %205 = vector.extract_strided_slice %173 {offsets = [0, 16], sizes = [16, 16], strides = [1, 1]} : vector<32x32xf32> to vector<16x16xf32>
    %206 = vector.extract_strided_slice %176 {offsets = [0, 16], sizes = [16, 16], strides = [1, 1]} : vector<32x32xf32> to vector<16x16xf32>
    %207 = tpu.transpose %205, [1, 0] : vector<16x16xf32> -> vector<16x16xf32>
    %cst_116 = arith.constant dense<0.000000e+00> : vector<8x16xf32>
    %208 = tpu.matmul %204, %207, %cst_116 {dimension_numbers = #tpu.dot_dimension_numbers<[1], [0], [0], [1], [0, 0, 1, 1], [], []>} : vector<8x16xf32>, vector<16x16xf32>, vector<8x16xf32> -> vector<8x16xf32>
    %cst_117 = arith.constant 2.500000e-01 : f32
    %209 = vector.broadcast %cst_117 : f32 to vector<8x16xf32>
    %210 = arith.mulf %208, %209 : vector<8x16xf32>
    %cst_118 = arith.constant 0.000000e+00 : f32
    %211 = vector.broadcast %cst_118 : f32 to vector<8x16xf32>
    %212 = arith.cmpf ogt, %178, %211 : vector<8x16xf32>
    %cst_119 = arith.constant -1.000000e+30 : f32
    %213 = vector.broadcast %cst_119 : f32 to vector<8x16xf32>
    %214 = arith.select %212, %213, %210 : vector<8x16xi1>, vector<8x16xf32>
    %cst_120 = arith.constant dense<0xFF800000> : vector<8xf32>
    %215 = vector.multi_reduction <maximumf>, %214, %cst_120 [1] : vector<8x16xf32> to vector<8xf32>
    %216 = vector.shape_cast %215 : vector<8xf32> to vector<8x1xf32>
    %217 = vector.broadcast %216 : vector<8x1xf32> to vector<8x16xf32>
    %218 = arith.subf %214, %217 : vector<8x16xf32>
    %219 = math.exp %218 : vector<8x16xf32>
    %cst_121 = arith.constant dense<0.000000e+00> : vector<8xf32>
    %220 = vector.multi_reduction <add>, %219, %cst_121 [1] : vector<8x16xf32> to vector<8xf32>
    %221 = vector.shape_cast %220 : vector<8xf32> to vector<8x1xf32>
    %222 = tpu.reciprocal %221 {approx = true} : vector<8x1xf32> -> vector<8x1xf32>
    %223 = vector.broadcast %222 : vector<8x1xf32> to vector<8x16xf32>
    %224 = arith.mulf %219, %223 : vector<8x16xf32>
    %c0_122 = arith.constant 0 : index
    %c1_123 = arith.constant 1 : index
    %c0_124 = arith.constant 0 : index
    %c0_125 = arith.constant 0 : index
    %225 = vector.load %arg32[%c0_122, %c1_123, %c0_124, %c0_125] : memref<2x2x8x16xf32, #tpu.memory_space<vmem>>, vector<1x1x8x16xf32>
    %226 = vector.shape_cast %225 : vector<1x1x8x16xf32> to vector<8x16xf32>
    %227 = vector.shape_cast %224 : vector<8x16xf32> to vector<1x1x8x16xf32>
    tpu.vector_store %arg32[%c0_122, %c1_123, %c0_124, %c0_125], %227 {strides = array<i32>} : memref<2x2x8x16xf32, #tpu.memory_space<vmem>>, vector<1x1x8x16xf32>,
    %cst_126 = arith.constant dense<0.000000e+00> : vector<8x16xf32>
    %228 = tpu.matmul %224, %206, %cst_126 {dimension_numbers = #tpu.dot_dimension_numbers<[1], [0], [0], [1], [0, 0, 1, 1], [], []>} : vector<8x16xf32>, vector<16x16xf32>, vector<8x16xf32> -> vector<8x16xf32>
    %229 = tpu.concatenate %203, %228 in 1 : vector<8x16xf32>, vector<8x16xf32> -> vector<8x32xf32>
    %230 = vector.extract_strided_slice %5 {offsets = [1, 0, 0], sizes = [1, 8, 16], strides = [1, 1, 1]} : vector<2x8x16xf32> to vector<1x8x16xf32>
    %231 = vector.shape_cast %230 : vector<1x8x16xf32> to vector<8x16xf32>
    %232 = vector.extract_strided_slice %170 {offsets = [8, 0], sizes = [8, 16], strides = [1, 1]} : vector<16x32xf32> to vector<8x16xf32>
    %233 = vector.extract_strided_slice %173 {offsets = [16, 0], sizes = [16, 16], strides = [1, 1]} : vector<32x32xf32> to vector<16x16xf32>
    %234 = vector.extract_strided_slice %176 {offsets = [16, 0], sizes = [16, 16], strides = [1, 1]} : vector<32x32xf32> to vector<16x16xf32>
    %235 = tpu.transpose %233, [1, 0] : vector<16x16xf32> -> vector<16x16xf32>
    %cst_127 = arith.constant dense<0.000000e+00> : vector<8x16xf32>
    %236 = tpu.matmul %232, %235, %cst_127 {dimension_numbers = #tpu.dot_dimension_numbers<[1], [0], [0], [1], [0, 0, 1, 1], [], []>} : vector<8x16xf32>, vector<16x16xf32>, vector<8x16xf32> -> vector<8x16xf32>
    %cst_128 = arith.constant 2.500000e-01 : f32
    %237 = vector.broadcast %cst_128 : f32 to vector<8x16xf32>
    %238 = arith.mulf %236, %237 : vector<8x16xf32>
    %cst_129 = arith.constant 0.000000e+00 : f32
    %239 = vector.broadcast %cst_129 : f32 to vector<8x16xf32>
    %240 = arith.cmpf ogt, %231, %239 : vector<8x16xf32>
    %cst_130 = arith.constant -1.000000e+30 : f32
    %241 = vector.broadcast %cst_130 : f32 to vector<8x16xf32>
    %242 = arith.select %240, %241, %238 : vector<8x16xi1>, vector<8x16xf32>
    %cst_131 = arith.constant dense<0xFF800000> : vector<8xf32>
    %243 = vector.multi_reduction <maximumf>, %242, %cst_131 [1] : vector<8x16xf32> to vector<8xf32>
    %244 = vector.shape_cast %243 : vector<8xf32> to vector<8x1xf32>
    %245 = vector.broadcast %244 : vector<8x1xf32> to vector<8x16xf32>
    %246 = arith.subf %242, %245 : vector<8x16xf32>
    %247 = math.exp %246 : vector<8x16xf32>
    %cst_132 = arith.constant dense<0.000000e+00> : vector<8xf32>
    %248 = vector.multi_reduction <add>, %247, %cst_132 [1] : vector<8x16xf32> to vector<8xf32>
    %249 = vector.shape_cast %248 : vector<8xf32> to vector<8x1xf32>
    %250 = tpu.reciprocal %249 {approx = true} : vector<8x1xf32> -> vector<8x1xf32>
    %251 = vector.broadcast %250 : vector<8x1xf32> to vector<8x16xf32>
    %252 = arith.mulf %247, %251 : vector<8x16xf32>
    %c1_133 = arith.constant 1 : index
    %c0_134 = arith.constant 0 : index
    %c0_135 = arith.constant 0 : index
    %c0_136 = arith.constant 0 : index
    %253 = vector.load %arg32[%c1_133, %c0_134, %c0_135, %c0_136] : memref<2x2x8x16xf32, #tpu.memory_space<vmem>>, vector<1x1x8x16xf32>
    %254 = vector.shape_cast %253 : vector<1x1x8x16xf32> to vector<8x16xf32>
    %255 = vector.shape_cast %252 : vector<8x16xf32> to vector<1x1x8x16xf32>
    tpu.vector_store %arg32[%c1_133, %c0_134, %c0_135, %c0_136], %255 {strides = array<i32>} : memref<2x2x8x16xf32, #tpu.memory_space<vmem>>, vector<1x1x8x16xf32>,
    %cst_137 = arith.constant dense<0.000000e+00> : vector<8x16xf32>
    %256 = tpu.matmul %252, %234, %cst_137 {dimension_numbers = #tpu.dot_dimension_numbers<[1], [0], [0], [1], [0, 0, 1, 1], [], []>} : vector<8x16xf32>, vector<16x16xf32>, vector<8x16xf32> -> vector<8x16xf32>
    %257 = vector.extract_strided_slice %170 {offsets = [8, 16], sizes = [8, 16], strides = [1, 1]} : vector<16x32xf32> to vector<8x16xf32>
    %258 = vector.extract_strided_slice %173 {offsets = [16, 16], sizes = [16, 16], strides = [1, 1]} : vector<32x32xf32> to vector<16x16xf32>
    %259 = vector.extract_strided_slice %176 {offsets = [16, 16], sizes = [16, 16], strides = [1, 1]} : vector<32x32xf32> to vector<16x16xf32>
    %260 = tpu.transpose %258, [1, 0] : vector<16x16xf32> -> vector<16x16xf32>
    %cst_138 = arith.constant dense<0.000000e+00> : vector<8x16xf32>
    %261 = tpu.matmul %257, %260, %cst_138 {dimension_numbers = #tpu.dot_dimension_numbers<[1], [0], [0], [1], [0, 0, 1, 1], [], []>} : vector<8x16xf32>, vector<16x16xf32>, vector<8x16xf32> -> vector<8x16xf32>
    %cst_139 = arith.constant 2.500000e-01 : f32
    %262 = vector.broadcast %cst_139 : f32 to vector<8x16xf32>
    %263 = arith.mulf %261, %262 : vector<8x16xf32>
    %cst_140 = arith.constant 0.000000e+00 : f32
    %264 = vector.broadcast %cst_140 : f32 to vector<8x16xf32>
    %265 = arith.cmpf ogt, %231, %264 : vector<8x16xf32>
    %cst_141 = arith.constant -1.000000e+30 : f32
    %266 = vector.broadcast %cst_141 : f32 to vector<8x16xf32>
    %267 = arith.select %265, %266, %263 : vector<8x16xi1>, vector<8x16xf32>
    %cst_142 = arith.constant dense<0xFF800000> : vector<8xf32>
    %268 = vector.multi_reduction <maximumf>, %267, %cst_142 [1] : vector<8x16xf32> to vector<8xf32>
    %269 = vector.shape_cast %268 : vector<8xf32> to vector<8x1xf32>
    %270 = vector.broadcast %269 : vector<8x1xf32> to vector<8x16xf32>
    %271 = arith.subf %267, %270 : vector<8x16xf32>
    %272 = math.exp %271 : vector<8x16xf32>
    %cst_143 = arith.constant dense<0.000000e+00> : vector<8xf32>
    %273 = vector.multi_reduction <add>, %272, %cst_143 [1] : vector<8x16xf32> to vector<8xf32>
    %274 = vector.shape_cast %273 : vector<8xf32> to vector<8x1xf32>
    %275 = tpu.reciprocal %274 {approx = true} : vector<8x1xf32> -> vector<8x1xf32>
    %276 = vector.broadcast %275 : vector<8x1xf32> to vector<8x16xf32>
    %277 = arith.mulf %272, %276 : vector<8x16xf32>
    %c1_144 = arith.constant 1 : index
    %c1_145 = arith.constant 1 : index
    %c0_146 = arith.constant 0 : index
    %c0_147 = arith.constant 0 : index
    %278 = vector.load %arg32[%c1_144, %c1_145, %c0_146, %c0_147] : memref<2x2x8x16xf32, #tpu.memory_space<vmem>>, vector<1x1x8x16xf32>
    %279 = vector.shape_cast %278 : vector<1x1x8x16xf32> to vector<8x16xf32>
    %280 = vector.shape_cast %277 : vector<8x16xf32> to vector<1x1x8x16xf32>
    tpu.vector_store %arg32[%c1_144, %c1_145, %c0_146, %c0_147], %280 {strides = array<i32>} : memref<2x2x8x16xf32, #tpu.memory_space<vmem>>, vector<1x1x8x16xf32>,
    %cst_148 = arith.constant dense<0.000000e+00> : vector<8x16xf32>
    %281 = tpu.matmul %277, %259, %cst_148 {dimension_numbers = #tpu.dot_dimension_numbers<[1], [0], [0], [1], [0, 0, 1, 1], [], []>} : vector<8x16xf32>, vector<16x16xf32>, vector<8x16xf32> -> vector<8x16xf32>
    %282 = tpu.concatenate %256, %281 in 1 : vector<8x16xf32>, vector<8x16xf32> -> vector<8x32xf32>
    %283 = tpu.concatenate %229, %282 in 0 : vector<8x32xf32>, vector<8x32xf32> -> vector<16x32xf32>
    %cst_149 = arith.constant dense<0.000000e+00> : vector<16x32xf32>
    %284 = tpu.matmul %283, %164, %cst_149 {dimension_numbers = #tpu.dot_dimension_numbers<[1], [0], [0], [1], [0, 0, 1, 1], [], []>} : vector<16x32xf32>, vector<32x32xf32>, vector<16x32xf32> -> vector<16x32xf32>
    %285 = vector.broadcast %165 : vector<1x32xf32> to vector<16x32xf32>
    %286 = arith.addf %284, %285 : vector<16x32xf32>
    %287 = arith.addf %157, %286 : vector<16x32xf32>
    %cst_150 = arith.constant dense<0.000000e+00> : vector<16xf32>
    %288 = vector.multi_reduction <add>, %287, %cst_150 [1] : vector<16x32xf32> to vector<16xf32>
    %289 = vector.shape_cast %288 : vector<16xf32> to vector<16x1xf32>
    %cst_151 = arith.constant 3.200000e+01 : f32
    %290 = vector.broadcast %cst_151 : f32 to vector<16x1xf32>
    %291 = arith.divf %289, %290 : vector<16x1xf32>
    %292 = vector.broadcast %291 : vector<16x1xf32> to vector<16x32xf32>
    %293 = arith.subf %287, %292 : vector<16x32xf32>
    %294 = arith.mulf %293, %293 : vector<16x32xf32>
    %cst_152 = arith.constant dense<0.000000e+00> : vector<16xf32>
    %295 = vector.multi_reduction <add>, %294, %cst_152 [1] : vector<16x32xf32> to vector<16xf32>
    %296 = vector.shape_cast %295 : vector<16xf32> to vector<16x1xf32>
    %cst_153 = arith.constant 3.200000e+01 : f32
    %297 = vector.broadcast %cst_153 : f32 to vector<16x1xf32>
    %298 = arith.divf %296, %297 : vector<16x1xf32>
    %299 = vector.broadcast %291 : vector<16x1xf32> to vector<16x32xf32>
    %300 = arith.subf %287, %299 : vector<16x32xf32>
    %cst_154 = arith.constant 9.99999974E-6 : f32
    %301 = vector.broadcast %cst_154 : f32 to vector<16x1xf32>
    %302 = arith.addf %298, %301 : vector<16x1xf32>
    %303 = math.rsqrt %302 : vector<16x1xf32>
    %304 = vector.broadcast %303 : vector<16x1xf32> to vector<16x32xf32>
    %305 = arith.mulf %300, %304 : vector<16x32xf32>
    %306 = vector.broadcast %166 : vector<1x32xf32> to vector<16x32xf32>
    %307 = arith.mulf %305, %306 : vector<16x32xf32>
    %308 = vector.broadcast %167 : vector<1x32xf32> to vector<16x32xf32>
    %309 = arith.addf %307, %308 : vector<16x32xf32>
    %c0_155 = arith.constant 0 : index
    %c0_156 = arith.constant 0 : index
    %310 = vector.load %arg24[%c0_155, %c0_156] : memref<32x64xf32, #tpu.memory_space<vmem>>, vector<32x64xf32>
    %cst_157 = arith.constant dense<0.000000e+00> : vector<16x64xf32>
    %311 = tpu.matmul %309, %310, %cst_157 {dimension_numbers = #tpu.dot_dimension_numbers<[1], [0], [0], [1], [0, 0, 1, 1], [], []>} : vector<16x32xf32>, vector<32x64xf32>, vector<16x64xf32> -> vector<16x64xf32>
    %c0_158 = arith.constant 0 : index
    %c0_159 = arith.constant 0 : index
    %312 = vector.load %arg25[%c0_158, %c0_159] : memref<1x64xf32, #tpu.memory_space<vmem>>, vector<1x64xf32>
    %313 = vector.broadcast %312 : vector<1x64xf32> to vector<16x64xf32>
    %314 = arith.addf %311, %313 : vector<16x64xf32>
    %cst_160 = arith.constant 0.000000e+00 : f32
    %315 = vector.broadcast %cst_160 : f32 to vector<16x64xf32>
    %316 = arith.maximumf %314, %315 : vector<16x64xf32>
    %c0_161 = arith.constant 0 : index
    %c0_162 = arith.constant 0 : index
    %317 = vector.load %arg26[%c0_161, %c0_162] : memref<64x32xf32, #tpu.memory_space<vmem>>, vector<64x32xf32>
    %cst_163 = arith.constant dense<0.000000e+00> : vector<16x32xf32>
    %318 = tpu.matmul %316, %317, %cst_163 {dimension_numbers = #tpu.dot_dimension_numbers<[1], [0], [0], [1], [0, 0, 1, 1], [], []>} : vector<16x64xf32>, vector<64x32xf32>, vector<16x32xf32> -> vector<16x32xf32>
    %c0_164 = arith.constant 0 : index
    %c0_165 = arith.constant 0 : index
    %319 = vector.load %arg27[%c0_164, %c0_165] : memref<1x32xf32, #tpu.memory_space<vmem>>, vector<1x32xf32>
    %320 = vector.broadcast %319 : vector<1x32xf32> to vector<16x32xf32>
    %321 = arith.addf %318, %320 : vector<16x32xf32>
    %322 = arith.addf %309, %321 : vector<16x32xf32>
    %c0_166 = arith.constant 0 : index
    %c0_167 = arith.constant 0 : index
    %323 = vector.load %arg28[%c0_166, %c0_167] : memref<1x32xf32, #tpu.memory_space<vmem>>, vector<1x32xf32>
    %c0_168 = arith.constant 0 : index
    %c0_169 = arith.constant 0 : index
    %324 = vector.load %arg29[%c0_168, %c0_169] : memref<1x32xf32, #tpu.memory_space<vmem>>, vector<1x32xf32>
    %cst_170 = arith.constant dense<0.000000e+00> : vector<16xf32>
    %325 = vector.multi_reduction <add>, %322, %cst_170 [1] : vector<16x32xf32> to vector<16xf32>
    %326 = vector.shape_cast %325 : vector<16xf32> to vector<16x1xf32>
    %cst_171 = arith.constant 3.200000e+01 : f32
    %327 = vector.broadcast %cst_171 : f32 to vector<16x1xf32>
    %328 = arith.divf %326, %327 : vector<16x1xf32>
    %329 = vector.broadcast %328 : vector<16x1xf32> to vector<16x32xf32>
    %330 = arith.subf %322, %329 : vector<16x32xf32>
    %331 = arith.mulf %330, %330 : vector<16x32xf32>
    %cst_172 = arith.constant dense<0.000000e+00> : vector<16xf32>
    %332 = vector.multi_reduction <add>, %331, %cst_172 [1] : vector<16x32xf32> to vector<16xf32>
    %333 = vector.shape_cast %332 : vector<16xf32> to vector<16x1xf32>
    %cst_173 = arith.constant 3.200000e+01 : f32
    %334 = vector.broadcast %cst_173 : f32 to vector<16x1xf32>
    %335 = arith.divf %333, %334 : vector<16x1xf32>
    %336 = vector.broadcast %328 : vector<16x1xf32> to vector<16x32xf32>
    %337 = arith.subf %322, %336 : vector<16x32xf32>
    %cst_174 = arith.constant 9.99999974E-6 : f32
    %338 = vector.broadcast %cst_174 : f32 to vector<16x1xf32>
    %339 = arith.addf %335, %338 : vector<16x1xf32>
    %340 = math.rsqrt %339 : vector<16x1xf32>
    %341 = vector.broadcast %340 : vector<16x1xf32> to vector<16x32xf32>
    %342 = arith.mulf %337, %341 : vector<16x32xf32>
    %343 = vector.broadcast %323 : vector<1x32xf32> to vector<16x32xf32>
    %344 = arith.mulf %342, %343 : vector<16x32xf32>
    %345 = vector.broadcast %324 : vector<1x32xf32> to vector<16x32xf32>
    %346 = arith.addf %344, %345 : vector<16x32xf32>
    %347 = vector.shape_cast %346 : vector<16x32xf32> to vector<2x8x32xf32>
    %c0_175 = arith.constant 0 : index
    %c0_176 = arith.constant 0 : index
    %c0_177 = arith.constant 0 : index
    %348 = vector.load %arg30[%c0_175, %c0_176, %c0_177] : memref<2x8x32xf32, #tpu.memory_space<vmem>>, vector<2x8x32xf32>
    tpu.vector_store %arg30[%c0_175, %c0_176, %c0_177], %347 {strides = array<i32>} : memref<2x8x32xf32, #tpu.memory_space<vmem>>, vector<2x8x32xf32>,
    return
  }
}

</mosaic_0001>

<bundles_post_ra>
// kernel: tpu_custom_call.1
= control target key start
LH: loop header
LB: loop body
LE: loop exit
PB: predicated region body
PF: predicated region fallthrough
CT: control target
= control target key end

     0   :  { %s4071_s6 = smov 1   ;;  %s4072_s10 = smov 2   ;;  %s4705_s0 = inlined_call_operand.smem [shape: u32[33], index: -1, kind: input, shape index: {}] }
   0x1   :  { %s4140_s5 = sld [smem:[%s4705_s0]]   ;;  %s4073_s14 = smov 3  }
   0x2   :  { %s4145_s9 = sld [smem:[%s4705_s0 + %s4071_s6]]   ;;  %s4074_s18 = smov 4  }
   0x3   :  { %s4150_s13 = sld [smem:[%s4705_s0 + %s4072_s10]]   ;;  %s4075_s22 = smov 5  }
   0x4   :  { %s4155_s17 = sld [smem:[%s4705_s0 + %s4073_s14]]   ;;  %s4076_s26 = smov 6  }
   0x5   :  { %s4160_s21 = sld [smem:[%s4705_s0 + %s4074_s18]]   ;;  %s4077_s30 = smov 7  }
   0x6   :  { %s4165_s25 = sld [smem:[%s4705_s0 + %s4075_s22]]   ;;  %s4078_s4 = smov 8  }
   0x7   :  { %s4170_s29 = sld [smem:[%s4705_s0 + %s4076_s26]]   ;;  %s4079_s10 = smov 9  }
   0x8   :  { %4717 = sst [smem:[#allocation48_spill]] %s4145_s9  ;;  %s4080_s15 = smov 10  }
   0x9   :  { %s4175_s3 = sld [smem:[%s4705_s0 + %s4077_s30]]   ;;  %s4081_s20 = smov 11  }
   0xa   :  { %s4180_s8 = sld [smem:[%s4705_s0 + %s4078_s4]]   ;;  %s4082_s26 = smov 12  }
   0xb   :  { %4718 = sst [smem:[#allocation49_spill]] %s4160_s21  ;;  %s4083_s1 = smov 13  }
   0xc   :  { %s4185_s14 = sld [smem:[%s4705_s0 + %s4079_s10]]   ;;  %s4084_s7 = smov 14  }
   0xd   :  { %4719 = sst [smem:[#allocation50_spill]] %s4170_s29  ;;  %s4086_s22 = smov 16  }
   0xe   :  { %s4190_s19 = sld [smem:[%s4705_s0 + %s4080_s15]]   ;;  %s4085_s15 = smov 15  }
   0xf   :  { %s4195_s24 = sld [smem:[%s4705_s0 + %s4081_s20]]   ;;  %s4087_s28 = smov 17  }
  0x10   :  { %s4200_s30 = sld [smem:[%s4705_s0 + %s4082_s26]]  }
  0x11   :  { %s4205_s6 = sld [smem:[%s4705_s0 + %s4083_s1]]  }
  0x12   :  { %s4210_s12 = sld [smem:[%s4705_s0 + %s4084_s7]]   ;;  %s4088_s7 = smov 18  }
  0x13   :  { %s4215_s20 = sld [smem:[%s4705_s0 + %s4085_s15]]   ;;  %s4089_s15 = smov 19  }
  0x14   :  { %4720 = sst [smem:[#allocation51_spill]] %s4190_s19 }
  0x15   :  { %s4220_s27 = sld [smem:[%s4705_s0 + %s4086_s22]]   ;;  %s4090_s22 = smov 20  }
  0x16   :  { %s4225_s4 = sld [smem:[%s4705_s0 + %s4087_s28]]   ;;  %s4091_s28 = smov 21  }
  0x17   :  { %s4230_s9 = sld [smem:[%s4705_s0 + %s4088_s7]]   ;;  %s4092_s7 = smov 22  }
  0x18   :  { %4721 = sst [smem:[#allocation52_spill]] %s4210_s12 }
  0x19   :  { %s4235_s19 = sld [smem:[%s4705_s0 + %s4089_s15]]   ;;  %s4093_s15 = smov 23  }
  0x1a   :  { %s4240_s29 = sld [smem:[%s4705_s0 + %s4090_s22]]   ;;  %s4094_s22 = smov 24  }
  0x1b   :  { %4722 = sst [smem:[#allocation53_spill]] %s4220_s27 }
  0x1c   :  { %s4245_s21 = sld [smem:[%s4705_s0 + %s4091_s28]]   ;;  %s4095_s28 = smov 25  }
  0x1d   :  { %4723 = sst [smem:[#allocation54_spill]] %s4230_s9 }
  0x1e   :  { %s4250_s9 = sld [smem:[%s4705_s0 + %s4092_s7]]   ;;  %s4096_s7 = smov 26  }
  0x1f   :  { %4724 = sst [smem:[#allocation55_spill]] %s4235_s19 }
  0x20   :  { %4725 = sst [smem:[#allocation56_spill]] %s4240_s29 }
  0x21   :  { %s4255_s19 = sld [smem:[%s4705_s0 + %s4093_s15]]   ;;  %s4097_s15 = smov 27  }
  0x22   :  { %4726 = sst [smem:[#allocation57_spill]] %s4245_s21 }
  0x23   :  { %s4260_s29 = sld [smem:[%s4705_s0 + %s4094_s22]]   ;;  %s4098_s22 = smov 28  }
  0x24   :  { %s4265_s21 = sld [smem:[%s4705_s0 + %s4095_s28]]   ;;  %s4099_s28 = smov 29  }
  0x25   :  { %s4270_s27 = sld [smem:[%s4705_s0 + %s4096_s7]]   ;;  %s4100_s7 = smov 30  }
  0x26   :  { %s4280_s12 = sld [smem:[%s4705_s0 + %s4098_s22]]   ;;  %s4102_s22 = smov 32  }
  0x27   :  { %4727 = sst [smem:[#allocation58_spill]] %s4255_s19 }
  0x28   :  { %s4275_s19 = sld [smem:[%s4705_s0 + %s4097_s15]]   ;;  %s4101_s15 = smov 31  }
  0x2a   :  { %4728 = sst [smem:[#allocation59_spill]] %s4265_s21 }
  0x2b   :  { %4729 = sst [smem:[#allocation60_spill]] %s4270_s27 }
  0x2c   :  { %4731 = sst [smem:[#allocation62_spill]] %s4280_s12 }
  0x2d   :  { %s4285_s21 = sld [smem:[%s4705_s0 + %s4099_s28]]  }
  0x2e   :  { %4730 = sst [smem:[#allocation61_spill]] %s4275_s19 }
  0x2f   :  { %s4290_s27 = sld [smem:[%s4705_s0 + %s4100_s7]]  }
  0x30   :  { %s4295_s19 = sld [smem:[%s4705_s0 + %s4101_s15]]  }
  0x31   :  { %s4300_s12 = sld [smem:[%s4705_s0 + %s4102_s22]]  }
  0x32   :  { %71 = vsyncpa [#allocation3], 0 }
  0x33   :  { %72 = vsyncpa [#allocation6], 0 }
  0x34   :  { %73 = vsyncpa [#allocation9], 0 }
  0x35   :  { %74 = vsyncpa [#allocation12], 0 }
  0x36   :  { %75 = vsyncpa [#allocation15], 0 }
  0x37   :  { %76 = vsyncpa [#allocation18], 0 }
  0x38   :  { %77 = vsyncpa [#allocation21], 0 }
  0x39   :  { %78 = vsyncpa [#allocation24], 0 }
  0x3a   :  { %79 = vsyncpa [#allocation27], 0 }
  0x3b   :  { %80 = vsyncpa [#allocation30], 0 }
  0x3c   :  { %81 = vsyncpa [#allocation4], 0 }
  0x3d   :  { %82 = vsyncpa [#allocation34], 0  ;;  %s4103_s28 = smov [#allocation5]   ;;  %s4104_s2 = smov [#allocation8]  }
  0x3e   :  { %s102_s1 = sshll.u32 %s4103_s28, 4  ;;  %s129_s0 = sshll.u32 %s4104_s2, 4  ;;  %s103_s1 = int_to_ptr.vmem [resolvable:$true] %s102_s1  ;;  %s4302_s0 = int_to_ptr.vmem [resolvable:$true] %s129_s0 }
  0x3f   :  { %s3563_s7 = scalar_lea.hbm %s4150_s13, 256 }
  0x40   :  { %p3564_p0 = scmp.ne.s32.totalorder %s4150_s13, %s3563_s7  ;;  %p3567_p1 = scmp.lt.u32.totalorder %s3563_s7, %s4150_s13 }
  0x42   :  { %p3569_p2 = pnand %p3567_p1, %p3564_p0 }
  0x44   :  { %3572 = shalt.err (!%p3569_p2)
}
  0x45   :  { %s3573_s10 = scalar_lea.vmem %s103_s1, 256  ;;  %p3578_p4 = scmp.lt.s32.totalorder %s103_s1, %s103_s1 }
  0x46   :  { %p3574_p3 = scmp.ne.s32.totalorder %s103_s1, %s3573_s10  ;;  %p3579_p5 = scmp.lt.s32.totalorder %s3573_s10, %s3573_s10 }
  0x48   :  { %p3580_p6 = por %p3579_p5, %p3578_p4 }
  0x4a   :  { %p3581_p7 = pnand %p3580_p6, %p3574_p3 }
  0x4c   :  { %3584 = shalt.err (!%p3581_p7)
}
  0x4d   :  { %s4105_s11 = smov 128   ;;  %s4106_s15 = smov 8  }
  0x4e   :  { %108 = dma.hbm_to_vmem [thread:$0]  %s4150_s13, 256, %s103_s1, [#allocation6], %s4105_s11, %s4105_s11, %s4106_s15  }
  0x4f   :  { %s3585_s16 = scalar_lea.hbm %s4165_s25, 16 }
  0x50   :  { %p3586_p8 = scmp.ne.s32.totalorder %s4165_s25, %s3585_s16  ;;  %p3589_p9 = scmp.lt.u32.totalorder %s3585_s16, %s4165_s25 }
  0x52   :  { %p3591_p10 = pnand %p3589_p9, %p3586_p8 }
  0x54   :  { %3594 = shalt.err (!%p3591_p10)
}
  0x55   :  { %s3595_s18 = scalar_lea.vmem %s4302_s0, 16  ;;  %s3599_s22 = scalar_lea.vmem %s4302_s0, 32 }
  0x56   :  { %p3596_p11 = scmp.ne.s32.totalorder %s4302_s0, %s3595_s18  ;;  %p3600_p12 = scmp.lt.s32.totalorder %s4302_s0, %s4302_s0 }
  0x57   :  { %p3601_p13 = scmp.lt.s32.totalorder %s3599_s22, %s3595_s18 }
  0x59   :  { %p3602_p0 = por %p3601_p13, %p3600_p12 }
  0x5b   :  { %p3603_p1 = pnand %p3602_p0, %p3596_p11 }
  0x5d   :  { %3606 = shalt.err (!%p3603_p1)
}
  0x5e   :  { %132 = dma.hbm_to_vmem [thread:$0]  %s4165_s25, 16, %s4302_s0, [#allocation9]  }
  0x5f   :  { %s4107_s13 = smov [#allocation11]   ;;  %s4108_s26 = smov [#allocation14]  }
  0x60   :  { %s150_s23 = sshll.u32 %s4107_s13, 4  ;;  %s175_s28 = sshll.u32 %s4108_s26, 4  ;;  %s151_s23 = int_to_ptr.vmem [resolvable:$true] %s150_s23  ;;  %s176_s28 = int_to_ptr.vmem [resolvable:$true] %s175_s28 }
  0x61   :  { %s3607_s1 = scalar_lea.hbm %s4180_s8, 512 }
  0x62   :  { %p3608_p2 = scmp.ne.s32.totalorder %s4180_s8, %s3607_s1  ;;  %p3611_p3 = scmp.lt.u32.totalorder %s3607_s1, %s4180_s8 }
  0x64   :  { %p3613_p4 = pnand %p3611_p3, %p3608_p2 }
  0x66   :  { %3616 = shalt.err (!%p3613_p4)
}
  0x67   :  { %s3617_s2 = scalar_lea.vmem %s151_s23, 512  ;;  %p3622_p6 = scmp.lt.s32.totalorder %s151_s23, %s151_s23 }
  0x68   :  { %p3618_p5 = scmp.ne.s32.totalorder %s151_s23, %s3617_s2  ;;  %p3623_p7 = scmp.lt.s32.totalorder %s3617_s2, %s3617_s2 }
  0x6a   :  { %p3624_p8 = por %p3623_p7, %p3622_p6 }
  0x6c   :  { %p3625_p9 = pnand %p3624_p8, %p3618_p5 }
  0x6e   :  { %3628 = shalt.err (!%p3625_p9)
}
  0x6f   :  { %156 = dma.hbm_to_vmem [thread:$0]  %s4180_s8, 512, %s151_s23, [#allocation12], %s4105_s11, %s4105_s11, %s4106_s15  }
  0x70   :  { %s3629_s25 = scalar_lea.hbm %s4195_s24, 16 }
  0x71   :  { %p3630_p10 = scmp.ne.s32.totalorder %s4195_s24, %s3629_s25  ;;  %p3633_p11 = scmp.lt.u32.totalorder %s3629_s25, %s4195_s24 }
  0x73   :  { %p3635_p12 = pnand %p3633_p11, %p3630_p10 }
  0x75   :  { %3638 = shalt.err (!%p3635_p12)
}
  0x76   :  { %s3639_s0 = scalar_lea.vmem %s176_s28, 16  ;;  %s3643_s7 = scalar_lea.vmem %s176_s28, 32 }
  0x77   :  { %p3640_p13 = scmp.ne.s32.totalorder %s176_s28, %s3639_s0  ;;  %p3644_p0 = scmp.lt.s32.totalorder %s176_s28, %s176_s28 }
  0x78   :  { %p3645_p1 = scmp.lt.s32.totalorder %s3643_s7, %s3639_s0 }
  0x7a   :  { %p3646_p2 = por %p3645_p1, %p3644_p0 }
  0x7c   :  { %p3647_p3 = pnand %p3646_p2, %p3640_p13 }
  0x7e   :  { %3650 = shalt.err (!%p3647_p3)
}
  0x7f   :  { %178 = dma.hbm_to_vmem [thread:$0]  %s4195_s24, 16, %s176_s28, [#allocation15]  }
  0x80   :  { %s4109_s10 = smov [#allocation17]   ;;  %s4110_s16 = smov [#allocation20]  }
  0x81   :  { %s195_s8 = sshll.u32 %s4109_s10, 4  ;;  %s217_s18 = sshll.u32 %s4110_s16, 4  ;;  %s196_s8 = int_to_ptr.vmem [resolvable:$true] %s195_s8  ;;  %s218_s18 = int_to_ptr.vmem [resolvable:$true] %s217_s18 }
  0x82   :  { %s3651_s22 = scalar_lea.hbm %s4205_s6, 16 }
  0x83   :  { %p3652_p4 = scmp.ne.s32.totalorder %s4205_s6, %s3651_s22  ;;  %p3655_p5 = scmp.lt.u32.totalorder %s3651_s22, %s4205_s6 }
  0x85   :  { %p3657_p6 = pnand %p3655_p5, %p3652_p4 }
  0x87   :  { %3660 = shalt.err (!%p3657_p6)
}
  0x88   :  { %s3661_s13 = scalar_lea.vmem %s196_s8, 16  ;;  %s3665_s23 = scalar_lea.vmem %s196_s8, 32 }
  0x89   :  { %p3662_p7 = scmp.ne.s32.totalorder %s196_s8, %s3661_s13  ;;  %p3666_p8 = scmp.lt.s32.totalorder %s196_s8, %s196_s8 }
  0x8a   :  { %p3667_p9 = scmp.lt.s32.totalorder %s3665_s23, %s3661_s13 }
  0x8c   :  { %p3668_p10 = por %p3667_p9, %p3666_p8 }
  0x8e   :  { %p3669_p11 = pnand %p3668_p10, %p3662_p7 }
  0x90   :  { %3672 = shalt.err (!%p3669_p11)
}
  0x91   :  { %198 = dma.hbm_to_vmem [thread:$0]  %s4205_s6, 16, %s196_s8, [#allocation18]  }
  0x92   :  { %s3673_s24 = scalar_lea.hbm %s4215_s20, 16 }
  0x93   :  { %p3674_p12 = scmp.ne.s32.totalorder %s4215_s20, %s3673_s24  ;;  %p3677_p13 = scmp.lt.u32.totalorder %s3673_s24, %s4215_s20 }
  0x95   :  { %p3679_p0 = pnand %p3677_p13, %p3674_p12 }
  0x97   :  { %3682 = shalt.err (!%p3679_p0)
}
  0x98   :  { %s3683_s26 = scalar_lea.vmem %s218_s18, 16  ;;  %s3687_s28 = scalar_lea.vmem %s218_s18, 32 }
  0x99   :  { %p3684_p1 = scmp.ne.s32.totalorder %s218_s18, %s3683_s26  ;;  %p3688_p2 = scmp.lt.s32.totalorder %s218_s18, %s218_s18 }
  0x9a   :  { %p3689_p3 = scmp.lt.s32.totalorder %s3687_s28, %s3683_s26 }
  0x9c   :  { %p3690_p4 = por %p3689_p3, %p3688_p2 }
  0x9e   :  { %p3691_p5 = pnand %p3690_p4, %p3684_p1 }
  0xa0   :  { %3694 = shalt.err (!%p3691_p5)
}
  0xa1   :  { %220 = dma.hbm_to_vmem [thread:$0]  %s4215_s20, 16, %s218_s18, [#allocation21]  }
  0xa2   :  { %s4111_s1 = smov [#allocation23]   ;;  %s4112_s2 = smov [#allocation26]  }
  0xa3   :  { %s239_s6 = sshll.u32 %s4111_s1, 4  ;;  %s267_s25 = sshll.u32 %s4112_s2, 4  ;;  %s240_s6 = int_to_ptr.vmem [resolvable:$true] %s239_s6  ;;  %s268_s25 = int_to_ptr.vmem [resolvable:$true] %s267_s25 }
  0xa4   :  { %s3695_s0 = scalar_lea.hbm %s4225_s4, 16 }
  0xa5   :  { %p3696_p6 = scmp.ne.s32.totalorder %s4225_s4, %s3695_s0  ;;  %p3699_p7 = scmp.lt.u32.totalorder %s3695_s0, %s4225_s4 }
  0xa7   :  { %p3701_p8 = pnand %p3699_p7, %p3696_p6 }
  0xa9   :  { %3704 = shalt.err (!%p3701_p8)
}
  0xaa   :  { %s3705_s7 = scalar_lea.vmem %s240_s6, 16  ;;  %s3709_s10 = scalar_lea.vmem %s240_s6, 32 }
  0xab   :  { %p3706_p9 = scmp.ne.s32.totalorder %s240_s6, %s3705_s7  ;;  %p3710_p10 = scmp.lt.s32.totalorder %s240_s6, %s240_s6 }
  0xac   :  { %p3711_p11 = scmp.lt.s32.totalorder %s3709_s10, %s3705_s7 }
  0xae   :  { %p3712_p12 = por %p3711_p11, %p3710_p10 }
  0xb0   :  { %p3713_p13 = pnand %p3712_p12, %p3706_p9 }
  0xb2   :  { %3716 = shalt.err (!%p3713_p13)
}
  0xb3   :  { %242 = dma.hbm_to_vmem [thread:$0]  %s4225_s4, 16, %s240_s6, [#allocation24]  }
  0xb4   :  { %s3717_s20 = scalar_lea.hbm %s4250_s9, 16 }
  0xb5   :  { %p3718_p0 = scmp.ne.s32.totalorder %s4250_s9, %s3717_s20  ;;  %p3721_p1 = scmp.lt.u32.totalorder %s3717_s20, %s4250_s9 }
  0xb7   :  { %p3723_p2 = pnand %p3721_p1, %p3718_p0 }
  0xb9   :  { %3726 = shalt.err (!%p3723_p2)
}
  0xba   :  { %s3727_s8 = scalar_lea.vmem %s268_s25, 16  ;;  %s3731_s16 = scalar_lea.vmem %s268_s25, 32 }
  0xbb   :  { %p3728_p3 = scmp.ne.s32.totalorder %s268_s25, %s3727_s8  ;;  %p3732_p4 = scmp.lt.s32.totalorder %s268_s25, %s268_s25 }
  0xbc   :  { %p3733_p5 = scmp.lt.s32.totalorder %s3731_s16, %s3727_s8 }
  0xbe   :  { %p3734_p6 = por %p3733_p5, %p3732_p4 }
  0xc0   :  { %p3735_p7 = pnand %p3734_p6, %p3728_p3 }
  0xc2   :  { %3738 = shalt.err (!%p3735_p7)
}
  0xc3   :  { %270 = dma.hbm_to_vmem [thread:$0]  %s4250_s9, 16, %s268_s25, [#allocation27]  }
  0xc4   :  { %s4113_s18 = smov [#allocation29]   ;;  %s4114_s22 = smov [#allocation2]  }
  0xc5   :  { %s286_s4 = sshll.u32 %s4113_s18, 4  ;;  %s88_s13 = sshll.u32 %s4114_s22, 4  ;;  %s287_s4 = int_to_ptr.vmem [resolvable:$true] %s286_s4  ;;  %s4348_s13 = int_to_ptr.vmem [resolvable:$true] %s88_s13 }
  0xc6   :  { %s3739_s23 = scalar_lea.hbm %s4260_s29, 512 }
  0xc7   :  { %p3740_p8 = scmp.ne.s32.totalorder %s4260_s29, %s3739_s23  ;;  %p3743_p9 = scmp.lt.u32.totalorder %s3739_s23, %s4260_s29 }
  0xc9   :  { %p3745_p10 = pnand %p3743_p9, %p3740_p8 }
  0xcb   :  { %3748 = shalt.err (!%p3745_p10)
}
  0xcc   :  { %s3749_s24 = scalar_lea.vmem %s287_s4, 512  ;;  %p3754_p12 = scmp.lt.s32.totalorder %s287_s4, %s287_s4 }
  0xcd   :  { %p3750_p11 = scmp.ne.s32.totalorder %s287_s4, %s3749_s24  ;;  %p3755_p13 = scmp.lt.s32.totalorder %s3749_s24, %s3749_s24 }
  0xcf   :  { %p3756_p0 = por %p3755_p13, %p3754_p12 }
  0xd1   :  { %p3757_p1 = pnand %p3756_p0, %p3750_p11 }
  0xd3   :  { %3760 = shalt.err (!%p3757_p1)
}
  0xd4   :  { %292 = dma.hbm_to_vmem [thread:$0]  %s4260_s29, 512, %s287_s4, [#allocation30], %s4105_s11, %s4105_s11, %s4106_s15  }
  0xd5   :  { %s3761_s9 = scalar_lea.hbm %s4140_s5, 256 }
  0xd6   :  { %p3762_p2 = scmp.ne.s32.totalorder %s4140_s5, %s3761_s9  ;;  %p3765_p3 = scmp.lt.u32.totalorder %s3761_s9, %s4140_s5 }
  0xd8   :  { %p3767_p4 = pnand %p3765_p3, %p3762_p2 }
  0xda   :  { %3770 = shalt.err (!%p3767_p4)
}
  0xdb   :  { %s3771_s26 = scalar_lea.vmem %s4348_s13, 256  ;;  %p3776_p6 = scmp.lt.s32.totalorder %s4348_s13, %s4348_s13 }
  0xdc   :  { %p3772_p5 = scmp.ne.s32.totalorder %s4348_s13, %s3771_s26  ;;  %p3777_p7 = scmp.lt.s32.totalorder %s3771_s26, %s3771_s26 }
  0xde   :  { %p3778_p8 = por %p3777_p7, %p3776_p6 }
  0xe0   :  { %p3779_p9 = pnand %p3778_p8, %p3772_p5 }
  0xe2   :  { %3782 = shalt.err (!%p3779_p9)
}
  0xe3   :  { %94 = dma.hbm_to_vmem [thread:$0]  %s4140_s5, 256, %s4348_s13, [#allocation3], %s4105_s11, %s4105_s11, %s4106_s15  }
  0xe4   :  { %s4115_s29 = smov [#allocation7]   ;;  %s4116_s1 = smov [#allocation10]  }
  0xe5   :  { %s114_s28 = sshll.u32 %s4115_s29, 4  ;;  %s141_s6 = sshll.u32 %s4116_s1, 4  ;;  %s115_s28 = int_to_ptr.vmem [resolvable:$true] %s114_s28  ;;  %s142_s6 = int_to_ptr.vmem [resolvable:$true] %s141_s6 }
  0xe6   :  { %s3783_s2 = scalar_lea.hbm %s4155_s17, 256 }
  0xe7   :  { %p3784_p10 = scmp.ne.s32.totalorder %s4155_s17, %s3783_s2  ;;  %p3787_p11 = scmp.lt.u32.totalorder %s3783_s2, %s4155_s17 }
  0xe9   :  { %p3789_p12 = pnand %p3787_p11, %p3784_p10 }
  0xeb   :  { %3792 = shalt.err (!%p3789_p12)
}
  0xec   :  { %s3793_s25 = scalar_lea.vmem %s115_s28, 256  ;;  %p3798_p0 = scmp.lt.s32.totalorder %s115_s28, %s115_s28 }
  0xed   :  { %p3794_p13 = scmp.ne.s32.totalorder %s115_s28, %s3793_s25  ;;  %p3799_p1 = scmp.lt.s32.totalorder %s3793_s25, %s3793_s25 }
  0xef   :  { %p3800_p2 = por %p3799_p1, %p3798_p0 }
  0xf1   :  { %p3801_p3 = pnand %p3800_p2, %p3794_p13 }
  0xf3   :  { %3804 = shalt.err (!%p3801_p3)
}
  0xf4   :  { %120 = dma.hbm_to_vmem [thread:$0]  %s4155_s17, 256, %s115_s28, [#allocation6], %s4105_s11, %s4105_s11, %s4106_s15  }
  0xf5   :  { %s3805_s5 = scalar_lea.hbm %s4175_s3, 16 }
  0xf6   :  { %p3806_p4 = scmp.ne.s32.totalorder %s4175_s3, %s3805_s5  ;;  %p3809_p5 = scmp.lt.u32.totalorder %s3805_s5, %s4175_s3 }
  0xf8   :  { %p3811_p6 = pnand %p3809_p5, %p3806_p4 }
  0xfa   :  { %3814 = shalt.err (!%p3811_p6)
}
  0xfb   :  { %s3815_s0 = scalar_lea.vmem %s142_s6, 16  ;;  %s3819_s7 = scalar_lea.vmem %s142_s6, 32 }
  0xfc   :  { %p3816_p7 = scmp.ne.s32.totalorder %s142_s6, %s3815_s0  ;;  %p3820_p8 = scmp.lt.s32.totalorder %s142_s6, %s142_s6 }
  0xfd   :  { %p3821_p9 = scmp.lt.s32.totalorder %s3819_s7, %s3815_s0 }
  0xff   :  { %p3822_p10 = por %p3821_p9, %p3820_p8 }
 0x101   :  { %p3823_p11 = pnand %p3822_p10, %p3816_p7 }
 0x103   :  { %3826 = shalt.err (!%p3823_p11)
}
 0x104   :  { %144 = dma.hbm_to_vmem [thread:$0]  %s4175_s3, 16, %s142_s6, [#allocation9]  }
 0x105   :  { %s4117_s10 = smov [#allocation13]   ;;  %s4118_s20 = smov [#allocation16]  }
 0x106   :  { %s163_s17 = sshll.u32 %s4117_s10, 4  ;;  %s185_s8 = sshll.u32 %s4118_s20, 4  ;;  %s164_s17 = int_to_ptr.vmem [resolvable:$true] %s163_s17  ;;  %s186_s8 = int_to_ptr.vmem [resolvable:$true] %s185_s8 }
 0x107   :  { %s3827_s16 = scalar_lea.hbm %s4185_s14, 16 }
 0x108   :  { %p3828_p12 = scmp.ne.s32.totalorder %s4185_s14, %s3827_s16  ;;  %p3831_p13 = scmp.lt.u32.totalorder %s3827_s16, %s4185_s14 }
 0x10a   :  { %p3833_p0 = pnand %p3831_p13, %p3828_p12 }
 0x10c   :  { %3836 = shalt.err (!%p3833_p0)
}
 0x10d   :  { %s3837_s18 = scalar_lea.vmem %s164_s17, 16  ;;  %s3841_s4 = scalar_lea.vmem %s164_s17, 32 }
 0x10e   :  { %p3838_p1 = scmp.ne.s32.totalorder %s164_s17, %s3837_s18  ;;  %p3842_p2 = scmp.lt.s32.totalorder %s164_s17, %s164_s17 }
 0x10f   :  { %p3843_p3 = scmp.lt.s32.totalorder %s3841_s4, %s3837_s18 }
 0x111   :  { %p3844_p4 = por %p3843_p3, %p3842_p2 }
 0x113   :  { %p3845_p5 = pnand %p3844_p4, %p3838_p1 }
 0x115   :  { %3848 = shalt.err (!%p3845_p5)
}
 0x116   :  { %166 = dma.hbm_to_vmem [thread:$0]  %s4185_s14, 16, %s164_s17, [#allocation12]  }
 0x117   :  { %s3849_s3 = scalar_lea.hbm %s4200_s30, 16 }
 0x118   :  { %p3850_p6 = scmp.ne.s32.totalorder %s4200_s30, %s3849_s3  ;;  %p3853_p7 = scmp.lt.u32.totalorder %s3849_s3, %s4200_s30 }
 0x11a   :  { %p3855_p8 = pnand %p3853_p7, %p3850_p6 }
 0x11c   :  { %3858 = shalt.err (!%p3855_p8)
}
 0x11d   :  { %s3859_s22 = scalar_lea.vmem %s186_s8, 16  ;;  %s3863_s13 = scalar_lea.vmem %s186_s8, 32 }
 0x11e   :  { %p3860_p9 = scmp.ne.s32.totalorder %s186_s8, %s3859_s22  ;;  %p3864_p10 = scmp.lt.s32.totalorder %s186_s8, %s186_s8 }
 0x11f   :  { %p3865_p11 = scmp.lt.s32.totalorder %s3863_s13, %s3859_s22 }
 0x121   :  { %p3866_p12 = por %p3865_p11, %p3864_p10 }
 0x123   :  { %p3867_p13 = pnand %p3866_p12, %p3860_p9 }
 0x125   :  { %3870 = shalt.err (!%p3867_p13)
}
 0x126   :  { %s4732_s23 = sld [smem:[#allocation52_spill]]  ;;  %s4119_s24 = smov [#allocation19]  }
 0x127   :  { %188 = dma.hbm_to_vmem [thread:$0]  %s4200_s30, 16, %s186_s8, [#allocation15]  }
 0x128   :  { %s204_s14 = sshll.u32 %s4119_s24, 4  ;;  %s4120_s9 = smov [#allocation22]   ;;  %s205_s14 = int_to_ptr.vmem [resolvable:$true] %s204_s14 }
 0x129   :  { %s226_s26 = sshll.u32 %s4120_s9, 4  ;;  %s4388_s26 = int_to_ptr.vmem [resolvable:$true] %s226_s26 }
 0x12c   :  { %s3871_s29 = scalar_lea.hbm %s4732_s23, 512 }
 0x12d   :  { %p3872_p0 = scmp.ne.s32.totalorder %s4732_s23, %s3871_s29  ;;  %p3875_p1 = scmp.lt.u32.totalorder %s3871_s29, %s4732_s23 }
 0x12f   :  { %p3877_p2 = pnand %p3875_p1, %p3872_p0 }
 0x131   :  { %3880 = shalt.err (!%p3877_p2)
}
 0x132   :  { %s3881_s28 = scalar_lea.vmem %s205_s14, 512  ;;  %p3886_p4 = scmp.lt.s32.totalorder %s205_s14, %s205_s14 }
 0x133   :  { %p3882_p3 = scmp.ne.s32.totalorder %s205_s14, %s3881_s28  ;;  %p3887_p5 = scmp.lt.s32.totalorder %s3881_s28, %s3881_s28 }
 0x135   :  { %p3888_p6 = por %p3887_p5, %p3886_p4 }
 0x137   :  { %p3889_p7 = pnand %p3888_p6, %p3882_p3 }
 0x139   :  { %3892 = shalt.err (!%p3889_p7)
}
 0x13a   :  { %s4733_s30 = sld [smem:[#allocation53_spill]] }
 0x13b   :  { %210 = dma.hbm_to_vmem [thread:$0]  %s4732_s23, 512, %s205_s14, [#allocation18], %s4105_s11, %s4105_s11, %s4106_s15  }
 0x140   :  { %s3893_s1 = scalar_lea.hbm %s4733_s30, 512 }
 0x141   :  { %p3894_p8 = scmp.ne.s32.totalorder %s4733_s30, %s3893_s1  ;;  %p3897_p9 = scmp.lt.u32.totalorder %s3893_s1, %s4733_s30 }
 0x143   :  { %p3899_p10 = pnand %p3897_p9, %p3894_p8 }
 0x145   :  { %3902 = shalt.err (!%p3899_p10)
}
 0x146   :  { %s3903_s6 = scalar_lea.vmem %s4388_s26, 512  ;;  %p3908_p12 = scmp.lt.s32.totalorder %s4388_s26, %s4388_s26 }
 0x147   :  { %p3904_p11 = scmp.ne.s32.totalorder %s4388_s26, %s3903_s6  ;;  %p3909_p13 = scmp.lt.s32.totalorder %s3903_s6, %s3903_s6 }
 0x149   :  { %p3910_p0 = por %p3909_p13, %p3908_p12 }
 0x14b   :  { %p3911_p1 = pnand %p3910_p0, %p3904_p11 }
 0x14d   :  { %3914 = shalt.err (!%p3911_p1)
}
 0x14e   :  { %s4734_s2 = sld [smem:[#allocation56_spill]]  ;;  %s4121_s25 = smov [#allocation25]  }
 0x14f   :  { %232 = dma.hbm_to_vmem [thread:$0]  %s4733_s30, 512, %s4388_s26, [#allocation21], %s4105_s11, %s4105_s11, %s4106_s15  }
 0x150   :  { %s252_s5 = sshll.u32 %s4121_s25, 4  ;;  %s4122_s0 = smov [#allocation28]   ;;  %s253_s5 = int_to_ptr.vmem [resolvable:$true] %s252_s5 }
 0x151   :  { %s277_s7 = sshll.u32 %s4122_s0, 4  ;;  %s278_s7 = int_to_ptr.vmem [resolvable:$true] %s277_s7 }
 0x154   :  { %s3915_s10 = scalar_lea.hbm %s4734_s2, 512 }
 0x155   :  { %p3916_p2 = scmp.ne.s32.totalorder %s4734_s2, %s3915_s10  ;;  %p3919_p3 = scmp.lt.u32.totalorder %s3915_s10, %s4734_s2 }
 0x157   :  { %p3921_p4 = pnand %p3919_p3, %p3916_p2 }
 0x159   :  { %3924 = shalt.err (!%p3921_p4)
}
 0x15a   :  { %s3925_s17 = scalar_lea.vmem %s253_s5, 512  ;;  %p3930_p6 = scmp.lt.s32.totalorder %s253_s5, %s253_s5 }
 0x15b   :  { %p3926_p5 = scmp.ne.s32.totalorder %s253_s5, %s3925_s17  ;;  %p3931_p7 = scmp.lt.s32.totalorder %s3925_s17, %s3925_s17 }
 0x15d   :  { %p3932_p8 = por %p3931_p7, %p3930_p6 }
 0x15f   :  { %p3933_p9 = pnand %p3932_p8, %p3926_p5 }
 0x161   :  { %3936 = shalt.err (!%p3933_p9)
}
 0x162   :  { %s4735_s20 = sld [smem:[#allocation58_spill]] }
 0x163   :  { %258 = dma.hbm_to_vmem [thread:$0]  %s4734_s2, 512, %s253_s5, [#allocation24], %s4105_s11, %s4105_s11, %s4106_s15  }
 0x168   :  { %s3937_s8 = scalar_lea.hbm %s4735_s20, 16 }
 0x169   :  { %p3938_p10 = scmp.ne.s32.totalorder %s4735_s20, %s3937_s8  ;;  %p3941_p11 = scmp.lt.u32.totalorder %s3937_s8, %s4735_s20 }
 0x16b   :  { %p3943_p12 = pnand %p3941_p11, %p3938_p10 }
 0x16d   :  { %3946 = shalt.err (!%p3943_p12)
}
 0x16e   :  { %s3947_s16 = scalar_lea.vmem %s278_s7, 16  ;;  %s3951_s18 = scalar_lea.vmem %s278_s7, 32 }
 0x16f   :  { %p3948_p13 = scmp.ne.s32.totalorder %s278_s7, %s3947_s16  ;;  %p3952_p0 = scmp.lt.s32.totalorder %s278_s7, %s278_s7 }
 0x170   :  { %p3953_p1 = scmp.lt.s32.totalorder %s3951_s18, %s3947_s16 }
 0x172   :  { %p3954_p2 = por %p3953_p1, %p3952_p0 }
 0x174   :  { %p3955_p3 = pnand %p3954_p2, %p3948_p13 }
 0x176   :  { %3958 = shalt.err (!%p3955_p3)
}
 0x177   :  { %s4736_s4 = sld [smem:[#allocation59_spill]]  ;;  %s4123_s3 = smov [#allocation31]  }
 0x178   :  { %280 = dma.hbm_to_vmem [thread:$0]  %s4735_s20, 16, %s278_s7, [#allocation27]  }
 0x179   :  { %s299_s22 = sshll.u32 %s4123_s3, 4  ;;  %s300_s22 = int_to_ptr.vmem [resolvable:$true] %s299_s22 }
 0x17d   :  { %s3959_s13 = scalar_lea.hbm %s4736_s4, 16 }
 0x17e   :  { %p3960_p4 = scmp.ne.s32.totalorder %s4736_s4, %s3959_s13  ;;  %p3963_p5 = scmp.lt.u32.totalorder %s3959_s13, %s4736_s4 }
 0x180   :  { %p3965_p6 = pnand %p3963_p5, %p3960_p4 }
 0x182   :  { %3968 = shalt.err (!%p3965_p6)
}
 0x183   :  { %s3969_s23 = scalar_lea.vmem %s300_s22, 16  ;;  %s3973_s24 = scalar_lea.vmem %s300_s22, 32 }
 0x184   :  { %p3970_p7 = scmp.ne.s32.totalorder %s300_s22, %s3969_s23  ;;  %p3974_p8 = scmp.lt.s32.totalorder %s300_s22, %s300_s22 }
 0x185   :  { %p3975_p9 = scmp.lt.s32.totalorder %s3973_s24, %s3969_s23 }
 0x187   :  { %p3976_p10 = por %p3975_p9, %p3974_p8 }
 0x189   :  { %p3977_p11 = pnand %p3976_p10, %p3970_p7 }
 0x18b   :  { %3980 = shalt.err (!%p3977_p11)
}
 0x18c   :  { %302 = dma.hbm_to_vmem [thread:$0]  %s4736_s4, 16, %s300_s22, [#allocation30]  }
 0x18d   :  { %4047 = dma.done.wait [#allocation3], 256  }
 0x18e   :  { %4048 = vsyncadd [#allocation3], 4294967040 }
 0x18f   :  { %4049 = dma.done.wait [#allocation6], 512  }
 0x190   :  { %4050 = vsyncadd [#allocation6], 4294966784 }
 0x191   :  { %4051 = dma.done.wait [#allocation9], 32  }
 0x192   :  { %4052 = vsyncadd [#allocation9], 4294967264 }
 0x193   :  { %4053 = dma.done.wait [#allocation12], 528  }
 0x194   :  { %4054 = vsyncadd [#allocation12], 4294966768 }
 0x195   :  { %4055 = dma.done.wait [#allocation15], 32  }
 0x196   :  { %4056 = vsyncadd [#allocation15], 4294967264 }
 0x197   :  { %4057 = dma.done.wait [#allocation18], 528  }
 0x198   :  { %4058 = vsyncadd [#allocation18], 4294966768 }
 0x199   :  { %4059 = dma.done.wait [#allocation21], 528  }
 0x19a   :  { %4060 = vsyncadd [#allocation21], 4294966768 }
 0x19b   :  { %4061 = dma.done.wait [#allocation24], 528  }
 0x19c   :  { %4062 = vsyncadd [#allocation24], 4294966768 }
 0x19d   :  { %4063 = dma.done.wait [#allocation27], 32  }
 0x19e   :  { %4064 = vsyncadd [#allocation27], 4294967264 }
 0x19f   :  { %4065 = dma.done.wait [#allocation30], 528  }
 0x1a0   :  { %4066 = vsyncadd [#allocation30], 4294966768  ;;  %s4737_s14 = sld [smem:[#allocation49_spill]]  ;;  %s4738_s9 = sld [smem:[#allocation50_spill]]  ;;  %vm406_vm0 = vcmask 261120   ;;  %v4428_v5 = vld [vmem:[#allocation2] sm:$0xff] }
 0x1a1   :  { %3110 = vmatprep.mubr.msk.f32.mxu0 %vm406_vm0, %v4428_v5  ;;  %v4436_v12 = vld [vmem:[#allocation2 + $0x8] sm:$0xff]  ;;  %v4124_v14 = vmov 0.0   ;;  %vm4125_vm1 = vmmov 0   ;;  %v388_v15 = vld [vmem:[#allocation11] sm:$0xff]  ;;  %v389_v16 = vld [vmem:[#allocation11 + $0x8] sm:$0xff]  ;;  %vm650_vm2 = vcmask 130048  }
 0x1a2   :  { %3135 = vmatprep.subr.mxu1 %v4124_v14  ;;  %3137 = vmatprep.mubr.msk.f32.mxu1 %vm4125_vm1, %v4124_v14  ;;  %v390_v17 = vld [vmem:[#allocation11 + $0x10] sm:$0xff]  ;;  %v3338_v18 = vpack.c.bf16 %v389_v16, %v388_v15  ;;  %v391_v19 = vld [vmem:[#allocation11 + $0x18] sm:$0xff]  ;;  %s4126_s26 = smov 112   ;;  %v2932_v31 = vld [vmem:[#allocation13] ss:$0 sm:$0xff]  ;;  %vm730_vm4 = vcmask 64512  }
 0x1a3   :  { %v3342_v20 = vpack.c.bf16 %v391_v19, %v390_v17  ;;  %v2929_v23 = vld [vmem:[#allocation10] ss:$0 sm:$0xff]  ;;  %v2926_v27 = vld [vmem:[#allocation8] ss:$0 sm:$0xff]  ;;  %v375_v49 = vld [vmem:[#allocation5 + $0x8] sm:$0xff]  ;;  %s4739_s29 = sld [smem:[#allocation51_spill]] }
 0x1a4   :  { %v374_v40 = vld [vmem:[#allocation5] sm:$0xff]  ;;  %vm1068_vm5 = vcmp.gt.f32.partialorder %v375_v49, 0.0  ;;  %s4127_s28 = smov 16   ;;  %s4740_s30 = sld [smem:[#allocation48_spill]]  ;;  %vm4547_vm6 = vmpackc.low %vm650_vm2, %vm650_vm2  ;;  %vm2707_vm9 = vcmask 523264  }
 0x1a5   :  { %vm728_vm3 = vcmp.gt.f32.partialorder %v374_v40, 0.0  ;;  %s4741_s1 = sld [smem:[#allocation54_spill]]  ;;  %s4744_s6 = sld [smem:[#allocation55_spill]] }
 0x1a6   :  { %v378_v0 = vld [vmem:[%s4737_s14] sm:$0xff]  ;;  %v379_v1 = vld [vmem:[%s4737_s14 + $0x8] sm:$0xff]  ;;  %v380_v2 = vld [vmem:[%s4737_s14 + $0x10] sm:$0xff]  ;;  %s4745_s2 = sld [smem:[#allocation57_spill]]  ;;  %s4746_s25 = sld [smem:[#allocation60_spill]] }
 0x1a7   :  { %v3322_v3 = vpack.c.bf16 %v379_v1, %v378_v0  ;;  %v381_v4 = vld [vmem:[%s4737_s14 + $0x18] sm:$0xff]  ;;  %v383_v7 = vld [vmem:[%s4738_s9] sm:$0xff]  ;;  %v384_v8 = vld [vmem:[%s4738_s9 + $0x8] sm:$0xff]  ;;  %s4747_s5 = sld [smem:[#allocation61_spill]]  ;;  %s4129_s0 = smov [#allocation33]  }
 0x1a8   :  { %v3326_v6 = vpack.c.bf16 %v381_v4, %v380_v2  ;;  %v3330_v9 = vpack.c.bf16 %v384_v8, %v383_v7  ;;  %v385_v10 = vld [vmem:[%s4738_s9 + $0x10] sm:$0xff]  ;;  %v386_v11 = vld [vmem:[%s4738_s9 + $0x18] sm:$0xff]  ;;  %s2854_s7 = sshll.u32 %s4129_s0, 4  ;;  %s2855_s7 = int_to_ptr.vmem [resolvable:$true] %s2854_s7 }
 0x1a9   :  { %3323 = vmatprep.subr.bf16.mxu0 %v3322_v3  ;;  %v3334_v13 = vpack.c.bf16 %v386_v11, %v385_v10  ;;  %v395_v40 = vld [vmem:[%s4739_s29 + $0x10] sm:$0xff]  ;;  %s3981_s10 = scalar_lea.vmem %s2855_s7, 512  ;;  %p3986_p13 = scmp.lt.s32.totalorder %s2855_s7, %s2855_s7 }
 0x1aa   :  { %3325 = vmatpush3.bf16.msra.mxu0 %v3322_v3  ;;  %p3982_p12 = scmp.ne.s32.totalorder %s2855_s7, %s3981_s10  ;;  %p3987_p0 = scmp.lt.s32.totalorder %s3981_s10, %s3981_s10 }
 0x1ab   :  { %3327 = vmatprep.subr.bf16.mxu0 %v3326_v6 }
 0x1ac   :  { %p3988_p1 = por %p3987_p0, %p3986_p13 }
 0x1ae   :  { %3329 = vmatpush3.bf16.msra.mxu0 %v3326_v6  ;;  %p3989_p2 = pnand %p3988_p1, %p3982_p12 }
 0x1af   :  { %3331 = vmatprep.subr.bf16.mxu0 %v3330_v9 }
 0x1b1   :  { %3111 = vmatmul.mubr.msk.f32.vlgmr.msra.gmra.mrb[0].mxu0 %vm406_vm0, %v4436_v12 }
 0x1b2   :  { %3333 = vmatpush3.bf16.msra.mxu0 %v3330_v9  ;;  %3121 = vmatprep.mubr.msk.f32.mxu0 %vm406_vm0, %v4428_v5 }
 0x1b3   :  { %3335 = vmatprep.subr.bf16.mxu0 %v3334_v13 }
 0x1b6   :  { %3337 = vmatpush3.bf16.msra.mxu0 %v3334_v13 }
 0x1b7   :  { %3339 = vmatprep.subr.bf16.mxu0 %v3338_v18 }
 0x1b9   :  { %3122 = vmatmul.mubr.msk.f32.vlgmr.msra.gmra.mrb[2].mxu0 %vm406_vm0, %v4436_v12 }
 0x1ba   :  { %3132 = vmatprep.mubr.msk.f32.mxu0 %vm406_vm0, %v4428_v5  ;;  %3341 = vmatpush3.bf16.msra.mxu0 %v3338_v18 }
 0x1bb   :  { %3343 = vmatprep.subr.bf16.mxu0 %v3342_v20 }
 0x1be   :  { %3345 = vmatpush3.bf16.msra.mxu0 %v3342_v20 }
 0x1bf   :  { %3145 = vmatprep.subr.mxu0 %v4124_v14 }
 0x1c1   :  { %3133 = vmatmul.mubr.msk.f32.vlgmr.msra.gmra.mrb[4].mxu0 %vm406_vm0, %v4436_v12 }
 0x1c2   :  { %3147 = vmatprep.mubr.msk.f32.mxu0 %vm4125_vm1, %v4124_v14 }
 0x284   :  { %v3112_v21 = vpop.f32.mrb[0].mxu0 }
 0x285   :  { %v479_v22 = vpop.f32.mrb[1].mxu0  ;;  %v485_v29 = vadd.f32 %v3112_v21, %v2926_v27 }
 0x286   :  { %v480_v30 = vadd.f32 %v2926_v27, %v479_v22 }
 0x28c   :  { %v3123_v24 = vpop.f32.mrb[2].mxu0 }
 0x28d   :  { %v566_v25 = vadd.f32 %v3123_v24, %v2929_v23  ;;  %v560_v26 = vpop.f32.mrb[3].mxu0 }
 0x28e   :  { %v561_v28 = vadd.f32 %v2929_v23, %v560_v26 }
 0x28f   :  { %1158 = vrot.lane.b32.xlu1 %v566_v25, %s4126_s26 }
 0x290   :  { %818 = vrot.lane.b32.xlu0 %v561_v28, %s4126_s26  ;;  %3136 = vmatpush3.xpose.msk.msra.mxu1 %vm650_vm2, %v561_v28 }
 0x291   :  { %3140 = vmatprep.subr.mxu1 %v4124_v14 }
 0x293   :  { %1156 = vrot.lane.b32.xlu1 %v485_v29, %s4126_s26  ;;  %3138 = vmatmul.mubr.msk.f32.vlgmr.msra.gmra.mrb[0].mxu1 %vm650_vm2, %v480_v30 }
 0x294   :  { %816 = vrot.lane.b32.xlu0 %v480_v30, %s4126_s26  ;;  %3142 = vmatprep.mubr.msk.f32.mxu1 %vm4125_vm1, %v4124_v14  ;;  %v3134_v32 = vpop.f32.mrb[4].mxu0 }
 0x295   :  { %v4463_v33 = vadd.f32 %v3134_v32, %v2932_v31  ;;  %v641_v34 = vpop.f32.mrb[5].mxu0 }
 0x296   :  { %v4465_v35 = vadd.f32 %v2932_v31, %v641_v34 }
 0x298   :  { %3141 = vmatpush3.msra.mxu1 %v4465_v35 }
 0x299   :  { %3150 = vmatprep.subr.mxu1 %v4124_v14 }
 0x301   :  { %v1159_v38 = vpop.permute.xlu1 %1158 }
 0x302   :  { %v819_v36 = vpop.permute.xlu0 %818 }
 0x303   :  { %3146 = vmatpush3.xpose.msk.msra.mxu0 %vm650_vm2, %v819_v36 }
 0x304   :  { %3155 = vmatprep.subr.mxu0 %v4124_v14 }
 0x305   :  { %v1157_v39 = vpop.permute.xlu1 %1156 }
 0x306   :  { %v817_v37 = vpop.permute.xlu0 %816 }
 0x307   :  { %3148 = vmatmul.mubr.msk.f32.vlgmr.msra.gmra.mrb[6].mxu0 %vm650_vm2, %v817_v37  ;;  %v393_v37 = vld [vmem:[%s4739_s29] sm:$0xff] }
 0x308   :  { %3156 = vmatpush3.xpose.msk.msra.mxu0 %vm650_vm2, %v566_v25  ;;  %3157 = vmatprep.mubr.msk.f32.mxu0 %vm4125_vm1, %v4124_v14 }
 0x309   :  { %3165 = vmatprep.subr.mxu0 %v4124_v14 }
 0x30b   :  { %3158 = vmatmul.mubr.msk.f32.vlgmr.msra.gmra.mrb[8].mxu0 %vm650_vm2, %v485_v29 }
 0x30c   :  { %3166 = vmatpush3.xpose.msk.msra.mxu0 %vm650_vm2, %v1159_v38  ;;  %3167 = vmatprep.mubr.msk.f32.mxu0 %vm4125_vm1, %v4124_v14  ;;  %v394_v38 = vld [vmem:[%s4739_s29 + $0x8] sm:$0xff] }
 0x30f   :  { %3168 = vmatmul.mubr.msk.f32.vlgmr.msra.gmra.mrb[10].mxu0 %vm650_vm2, %v1157_v39  ;;  %v3346_v39 = vpack.c.bf16 %v394_v38, %v393_v37 }
 0x311   :  { %3347 = vmatprep.subr.bf16.mxu0 %v3346_v39 }
 0x312   :  { %3349 = vmatpush3.bf16.msra.mxu0 %v3346_v39 }
 0x366   :  { %v723_v41 = vpop.f32.mrb[0].mxu1 }
 0x367   :  { %v727_v42 = vmul.f32 0.25, %v723_v41  ;;  %v3139_v43 = vpop.f32.mrb[1].mxu1  ;;  %v396_v41 = vld [vmem:[%s4739_s29 + $0x18] sm:$0xff] }
 0x369   :  { %v729_v44 = vsel %vm728_vm3, -1e+30, %v727_v42  ;;  %v3350_v42 = vpack.c.bf16 %v396_v41, %v395_v40  ;;  %v2955_v41 = vld [vmem:[#allocation23] ss:$0 sm:$0xff] }
 0x36a   :  { %v731_v45 = vsel %vm730_vm4, %v729_v44, -inf }
 0x36b   :  { %732 = vmax.xlane.f32.xlu0 %v731_v45  ;;  %3351 = vmatprep.subr.bf16.mxu0 %v3350_v42 }
 0x36c   :  { %3353 = vmatpush3.bf16.msra.mxu0 %v3350_v42 }
 0x3da   :  { %v890_v46 = vpop.f32.mrb[6].mxu0 }
 0x3db   :  { %v894_v47 = vmul.f32 0.25, %v890_v46  ;;  %v3149_v48 = vpop.f32.mrb[7].mxu0 }
 0x3dd   :  { %v895_v50 = vsel %vm728_vm3, -1e+30, %v894_v47 }
 0x3de   :  { %v1063_v51 = vpop.f32.mrb[8].mxu0  ;;  %v896_v52 = vsel %vm730_vm4, %v895_v50, -inf }
 0x3df   :  { %v1067_v53 = vmul.f32 0.25, %v1063_v51  ;;  %897 = vmax.xlane.f32.xlu1 %v896_v52  ;;  %v3159_v54 = vpop.f32.mrb[9].mxu0 }
 0x3e1   :  { %v1069_v55 = vsel %vm1068_vm5, -1e+30, %v1067_v53  ;;  %v2947_v53 = vld [vmem:[#allocation14] ss:$0 sm:$0xff] }
 0x3e2   :  { %v1230_v56 = vpop.f32.mrb[10].mxu0  ;;  %v1070_v57 = vsel %vm730_vm4, %v1069_v55, -inf }
 0x3e3   :  { %v1234_v58 = vmul.f32 0.25, %v1230_v56  ;;  %v3169_v59 = vpop.f32.mrb[11].mxu0  ;;  %1071 = vmax.xlane.f32.xlu0 %v1070_v57 }
 0x3e5   :  { %v1235_v60 = vsel %vm1068_vm5, -1e+30, %v1234_v58 }
 0x3e6   :  { %v1236_v61 = vsel %vm730_vm4, %v1235_v60, -inf }
 0x3e7   :  { %1237 = vmax.xlane.f32.xlu0 %v1236_v61 }
 0x3f8   :  { %v733_v62 = vpop.xlane.xlu0 %732 }
 0x3f9   :  { %v734_v63 = vsub.f32 %v729_v44, %v733_v62 }
 0x3fb   :  { %v735_v0 = vmul.f32 1.442695, %v734_v63 }
 0x3fd   :  { %3519 = vpow2.f32 %v735_v0 }
 0x407   :  { %v3520_v1 = vpop.eup %3519 }
 0x408   :  { %v737_v2 = vsel %vm730_vm4, %v3520_v1, 0.0 }
 0x409   :  { %738 = vadd.xlane.f32.xlu1 %v737_v2 }
 0x46c   :  { %v898_v3 = vpop.xlane.xlu1 %897 }
 0x46d   :  { %v899_v4 = vsub.f32 %v895_v50, %v898_v3 }
 0x46f   :  { %v900_v6 = vmul.f32 1.442695, %v899_v4 }
 0x470   :  { %v1072_v7 = vpop.xlane.xlu0 %1071 }
 0x471   :  { %3521 = vpow2.f32 %v900_v6  ;;  %v1073_v8 = vsub.f32 %v1069_v55, %v1072_v7 }
 0x473   :  { %v1074_v9 = vmul.f32 1.442695, %v1073_v8  ;;  %v1469_v8 = vld [vmem:[#allocation22 + $0x8] sm:$0xff] }
 0x474   :  { %v1238_v10 = vpop.xlane.xlu0 %1237 }
 0x475   :  { %3523 = vpow2.f32 %v1074_v9  ;;  %v1239_v11 = vsub.f32 %v1235_v60, %v1238_v10  ;;  %v1470_v10 = vld [vmem:[#allocation22 + $0x10] sm:$0xff] }
 0x477   :  { %v1240_v13 = vmul.f32 1.442695, %v1239_v11  ;;  %v1471_v11 = vld [vmem:[#allocation22 + $0x18] sm:$0xff] }
 0x479   :  { %3525 = vpow2.f32 %v1240_v13  ;;  %v3366_v13 = vpack.c.bf16 %v1471_v11, %v1470_v10 }
 0x47b   :  { %v3522_v15 = vpop.eup %3521 }
 0x47c   :  { %v902_v16 = vsel %vm730_vm4, %v3522_v15, 0.0 }
 0x47d   :  { %903 = vadd.xlane.f32.xlu0 %v902_v16  ;;  %v4529_v16 = vld [vmem:[%s4740_s30 + $0x8] sm:$0xff] }
 0x47f   :  { %v3524_v17 = vpop.eup %3523 }
 0x480   :  { %v1076_v18 = vsel %vm730_vm4, %v3524_v17, 0.0 }
 0x481   :  { %1077 = vadd.xlane.f32.xlu1 %v1076_v18  ;;  %v1464_v18 = vld [vmem:[#allocation19 + $0x8] sm:$0xff] }
 0x483   :  { %v3526_v19 = vpop.eup %3525 }
 0x484   :  { %v1242_v20 = vsel %vm730_vm4, %v3526_v19, 0.0 }
 0x485   :  { %1243 = vadd.xlane.f32.xlu0 %v1242_v20  ;;  %v1465_v20 = vld [vmem:[#allocation19 + $0x10] sm:$0xff] }
 0x492   :  { %910 = vrot.lane.b32.xlu1 %v4465_v35, %s4126_s26 }
 0x496   :  { %v739_v21 = vpop.xlane.xlu1 %738 }
 0x497   :  { %3527 = vrcp.f32 %v739_v21  ;;  %v1466_v21 = vld [vmem:[#allocation19 + $0x18] sm:$0xff] }
 0x49b   :  { %1250 = vrot.lane.b32.xlu0 %v4463_v33, %s4126_s26 }
 0x4a1   :  { %v3528_v22 = vpop.eup %3527 }
 0x4a2   :  { %v741_v23 = vmul.f32 %v3528_v22, %v3520_v1  ;;  %v3358_v22 = vpack.c.bf16 %v1466_v21, %v1465_v20 }
 0x4a4   :  { %742 = vst.msk [vmem:[#allocation33] sm:$0xff] %vm730_vm4, %v741_v23  ;;  %3143 = vmatmul.mubr.msk.f32.vlgmr.msra.gmra.mrb[2].mxu1 %vm730_vm4, %v741_v23  ;;  %v4128_v23 = vmov 0.0|0.0  }
 0x4a5   :  { %3152 = vmatprep.mubr.msk.f32.mxu1 %vm4125_vm1, %v4124_v14 }
 0x50a   :  { %v904_v24 = vpop.xlane.xlu0 %903 }
 0x50b   :  { %3529 = vrcp.f32 %v904_v24  ;;  %v372_v24 = vld [vmem:[%s4740_s30 + $0x10] sm:$0xff] }
 0x50e   :  { %v1078_v25 = vpop.xlane.xlu1 %1077 }
 0x50f   :  { %3531 = vrcp.f32 %v1078_v25 }
 0x512   :  { %v911_v26 = vpop.permute.xlu1 %910  ;;  %v1244_v27 = vpop.xlane.xlu0 %1243 }
 0x513   :  { %3533 = vrcp.f32 %v1244_v27  ;;  %3151 = vmatpush3.msra.mxu1 %v911_v26 }
 0x514   :  { %3160 = vmatprep.subr.mxu1 %v4124_v14 }
 0x515   :  { %v3530_v28 = vpop.eup %3529 }
 0x516   :  { %v906_v29 = vmul.f32 %v3530_v28, %v3522_v15  ;;  %v1251_v32 = vpop.permute.xlu0 %1250  ;;  %v370_v15 = vld [vmem:[%s4740_s30] sm:$0xff] }
 0x518   :  { %908 = vst.msk [vmem:[#allocation33 + $0x8] sm:$0xff] %vm730_vm4, %v906_v29  ;;  %3153 = vmatmul.mubr.msk.f32.vlgmr.msra.gmra.mrb[4].mxu1 %vm730_vm4, %v906_v29 }
 0x519   :  { %v3532_v30 = vpop.eup %3531  ;;  %3161 = vmatpush3.msra.mxu1 %v4463_v33  ;;  %3162 = vmatprep.mubr.msk.f32.mxu1 %vm4125_vm1, %v4124_v14 }
 0x51a   :  { %v1080_v31 = vmul.f32 %v3532_v30, %v3524_v17  ;;  %3170 = vmatprep.subr.mxu1 %v4124_v14  ;;  %v1463_v17 = vld [vmem:[#allocation19] sm:$0xff] }
 0x51c   :  { %1082 = vst.msk [vmem:[#allocation33 + $0x10] sm:$0xff] %vm730_vm4, %v1080_v31  ;;  %3163 = vmatmul.mubr.msk.f32.vlgmr.msra.gmra.mrb[6].mxu1 %vm730_vm4, %v1080_v31 }
 0x51d   :  { %v3534_v34 = vpop.eup %3533  ;;  %3171 = vmatpush3.msra.mxu1 %v1251_v32  ;;  %3172 = vmatprep.mubr.msk.f32.mxu1 %vm4125_vm1, %v4124_v14  ;;  %v2950_v32 = vld [vmem:[#allocation16] ss:$0 sm:$0xff] }
 0x51e   :  { %v1246_v33 = vmul.f32 %v3534_v34, %v3526_v19  ;;  %v3354_v19 = vpack.c.bf16 %v1464_v18, %v1463_v17 }
 0x520   :  { %1248 = vst.msk [vmem:[#allocation33 + $0x18] sm:$0xff] %vm730_vm4, %v1246_v33  ;;  %3173 = vmatmul.mubr.msk.f32.vlgmr.msra.gmra.mrb[8].mxu1 %vm730_vm4, %v1246_v33  ;;  %3355 = vmatprep.subr.bf16.mxu1 %v3354_v19  ;;  %v2951_v33 = vld [vmem:[#allocation17] ss:$0 sm:$0xff] }
 0x521   :  { %3357 = vmatpush3.bf16.msra.mxu1 %v3354_v19 }
 0x522   :  { %3359 = vmatprep.subr.bf16.mxu1 %v3358_v22 }
 0x525   :  { %3361 = vmatpush3.bf16.msra.mxu1 %v3358_v22 }
 0x577   :  { %v812_v35 = vpop.f32.mrb[2].mxu1 }
 0x578   :  { %v3144_v36 = vpop.f32.mrb[3].mxu1 }
 0x5eb   :  { %v982_v43 = vpop.f32.mrb[4].mxu1 }
 0x5ec   :  { %987 = vrot.lane.b32.xlu1 %v982_v43, %s4127_s28  ;;  %v3154_v44 = vpop.f32.mrb[5].mxu1 }
 0x5ef   :  { %v1152_v45 = vpop.f32.mrb[6].mxu1 }
 0x5f0   :  { %v3164_v46 = vpop.f32.mrb[7].mxu1 }
 0x5f3   :  { %v1322_v47 = vpop.f32.mrb[8].mxu1 }
 0x5f4   :  { %1327 = vrot.lane.b32.xlu1 %v1322_v47, %s4127_s28  ;;  %v3174_v48 = vpop.f32.mrb[9].mxu1 }
 0x65e   :  { %v988_v49 = vpop.permute.xlu1 %987 }
 0x65f   :  { %v990_v50 = vsel %vm650_vm2, %v812_v35, %v988_v49  ;;  %v373_v49 = vld [vmem:[%s4740_s30 + $0x18] sm:$0xff] }
 0x660   :  { %3183 = vmatprep.mubr.msk.f32.mxu0 %vm406_vm0, %v990_v50  ;;  %v1473_v50 = vld [vmem:[%s4741_s1] sm:$0xff] }
 0x666   :  { %v1328_v51 = vpop.permute.xlu1 %1327 }
 0x667   :  { %v1330_v52 = vsel %vm650_vm2, %v1152_v45, %v1328_v51  ;;  %v1474_v51 = vld [vmem:[%s4741_s1 + $0x8] sm:$0xff] }
 0x668   :  { %3184 = vmatmul.mubr.msk.f32.vlgmr.msra.gmra.mrb[12].mxu0 %vm406_vm0, %v1330_v52  ;;  %v1475_v52 = vld [vmem:[%s4741_s1 + $0x10] sm:$0xff] }
 0x669   :  { %3205 = vmatprep.mubr.msk.f32.mxu0 %vm406_vm0, %v370_v15 }
 0x73b   :  { %v3185_v54 = vpop.f32.mrb[12].mxu0 }
 0x73c   :  { %v1415_v55 = vadd.f32 %v3185_v54, %v2947_v53  ;;  %v1409_v56 = vpop.f32.mrb[13].mxu0  ;;  %v1476_v54 = vld [vmem:[%s4741_s1 + $0x18] sm:$0xff] }
 0x73d   :  { %v1410_v57 = vadd.f32 %v2947_v53, %v1409_v56  ;;  %v3370_v53 = vpack.c.bf16 %v1474_v51, %v1473_v50 }
 0x73e   :  { %v1419_v58 = vadd.f32 %v1415_v55, %v4436_v12  ;;  %v1468_v12 = vld [vmem:[#allocation22] sm:$0xff]  ;;  %v3374_v55 = vpack.c.bf16 %v1476_v54, %v1475_v52 }
 0x73f   :  { %v1418_v59 = vadd.f32 %v1410_v57, %v4428_v5  ;;  %v3362_v9 = vpack.c.bf16 %v1469_v8, %v1468_v12  ;;  %3371 = vmatprep.subr.bf16.mxu1 %v3370_v53  ;;  %v376_v12 = vld [vmem:[#allocation7] sm:$0xff] }
 0x740   :  { %v1423_v60 = vsel %vm406_vm0, %v1419_v58, 0.0  ;;  %vm1846_vm7 = vcmp.gt.f32.partialorder %v376_v12, 0.0 }
 0x741   :  { %1424 = vadd.xlane.f32.xlu1 %v1423_v60  ;;  %v1420_v61 = vsel %vm406_vm0, %v1418_v59, 0.0  ;;  %3363 = vmatprep.subr.bf16.mxu0 %v3362_v9 }
 0x742   :  { %1421 = vadd.xlane.f32.xlu0 %v1420_v61  ;;  %3365 = vmatpush3.bf16.msra.mxu0 %v3362_v9 }
 0x743   :  { %3367 = vmatprep.subr.bf16.mxu0 %v3366_v13 }
 0x746   :  { %3369 = vmatpush3.bf16.msra.mxu0 %v3366_v13 }
 0x747   :  { %3378 = vmatprep.subr.bf16.mxu0 %v4128_v23 }
 0x749   :  { %3206 = vmatmul.mubr.msk.f32.vlgmr.msra.gmra.mrb[14].mxu0 %vm406_vm0, %v4529_v16 }
 0x74a   :  { %3208 = vmatprep.mubr.msk.f32.mxu0 %vm406_vm0, %v372_v24 }
 0x74d   :  { %3209 = vmatmul.mubr.msk.f32.gmra.mrb[16].mxu0 %vm406_vm0, %v373_v49 }
 0x74e   :  { %3229 = vmatprep.mubr.msk.f32.mxu0 %vm4125_vm1, %v4124_v14 }
 0x7ce   :  { %v1425_v62 = vpop.xlane.xlu1 %1424 }
 0x7cf   :  { %v1428_v63 = vmul.f32 0.03125, %v1425_v62  ;;  %v1422_v0 = vpop.xlane.xlu0 %1421 }
 0x7d0   :  { %v1427_v1 = vmul.f32 0.03125, %v1422_v0 }
 0x7d1   :  { %v1430_v2 = vsub.f32 %v1419_v58, %v1428_v63 }
 0x7d2   :  { %v1429_v3 = vsub.f32 %v1418_v59, %v1427_v1  ;;  %v2952_v59 = vld [vmem:[#allocation20] ss:$0 sm:$0xff] }
 0x7d3   :  { %v1432_v7 = vmul.f32 %v1430_v2, %v1430_v2 }
 0x7d4   :  { %v1431_v4 = vmul.f32 %v1429_v3, %v1429_v3 }
 0x7d5   :  { %v1436_v5 = vsel %vm406_vm0, %v1432_v7, 0.0 }
 0x7d6   :  { %v1433_v6 = vsel %vm406_vm0, %v1431_v4, 0.0 }
 0x7d7   :  { %1434 = vadd.xlane.f32.xlu0 %v1433_v6 }
 0x7db   :  { %1437 = vadd.xlane.f32.xlu0 %v1436_v5 }
 0x81c   :  { %v3207_v42 = vpop.f32.mrb[14].mxu0 }
 0x81d   :  { %v1662_v43 = vadd.f32 %v3207_v42, %v2955_v41  ;;  %v1656_v44 = vpop.f32.mrb[15].mxu0 }
 0x81e   :  { %v1657_v45 = vadd.f32 %v2955_v41, %v1656_v44 }
 0x820   :  { %v3499_v47 = vpack.i.bf16 %v1662_v43, %v1657_v45  ;;  %v3379_v48 = vpack.c.bf16 %v1662_v43, %v1657_v45  ;;  %v3210_v1 = vpop.f32.mrb[16].mxu0 }
 0x822   :  { %3500 = vrot.lane.b32.xlu1 %v3499_v47, %s4126_s26  ;;  %3381 = vmatpush3.bf16.xpose.msk.msra.mxu0 %vm4547_vm6, %v3379_v48 }
 0x823   :  { %3385 = vmatprep.subr.bf16.mxu0 %v4128_v23 }
 0x864   :  { %v1435_v25 = vpop.xlane.xlu0 %1434 }
 0x865   :  { %v1439_v26 = vmul.f32 0.03125, %v1435_v25 }
 0x867   :  { %v1441_v27 = vadd.f32 1e-05, %v1439_v26 }
 0x868   :  { %v1438_v28 = vpop.xlane.xlu0 %1437 }
 0x869   :  { %3535 = vrsqrt.f32 %v1441_v27  ;;  %v1440_v29 = vmul.f32 0.03125, %v1438_v28 }
 0x86b   :  { %v1442_v30 = vadd.f32 1e-05, %v1440_v29 }
 0x86d   :  { %3537 = vrsqrt.f32 %v1442_v30 }
 0x873   :  { %v3536_v31 = vpop.eup %3535 }
 0x874   :  { %v1445_v34 = vmul.f32 %v3536_v31, %v1429_v3  ;;  %v1666_v3 = vpop.f32.mrb[17].mxu0 }
 0x875   :  { %v4581_v4 = vadd.f32 %v2955_v41, %v1666_v3 }
 0x876   :  { %v1453_v35 = vmul.f32 %v2950_v32, %v1445_v34 }
 0x877   :  { %v3538_v36 = vpop.eup %3537 }
 0x878   :  { %v1446_v37 = vmul.f32 %v3538_v36, %v1430_v2  ;;  %v4536_v38 = vadd.f32 %v2951_v33, %v1453_v35  ;;  %v4579_v2 = vadd.f32 %v3210_v1, %v2955_v41 }
 0x87a   :  { %v1454_v39 = vmul.f32 %v2950_v32, %v1446_v37  ;;  %3194 = vmatprep.mubr.msk.f32.mxu1 %vm406_vm0, %v4536_v38  ;;  %v3509_v6 = vpack.i.bf16 %v4579_v2, %v4581_v4  ;;  %v3393_v7 = vpack.c.bf16 %v4579_v2, %v4581_v4 }
 0x87c   :  { %v4540_v40 = vadd.f32 %v2951_v33, %v1454_v39 }
 0x87e   :  { %3195 = vmatmul.mubr.msk.f32.vlgmr.msra.gmra.mrb[10].mxu1 %vm406_vm0, %v4540_v40 }
 0x87f   :  { %3219 = vmatprep.mubr.msk.f32.mxu1 %vm406_vm0, %v370_v15  ;;  %3373 = vmatpush3.bf16.msra.mxu1 %v3370_v53 }
 0x880   :  { %3375 = vmatprep.subr.bf16.mxu1 %v3374_v55 }
 0x883   :  { %3377 = vmatpush3.bf16.msra.mxu1 %v3374_v55 }
 0x884   :  { %3382 = vmatprep.subr.bf16.mxu1 %v4128_v23 }
 0x886   :  { %3220 = vmatmul.mubr.msk.f32.vlgmr.msra.gmra.mrb[12].mxu1 %vm406_vm0, %v4529_v16  ;;  %v2960_v16 = vld [vmem:[%s4744_s6] ss:$0 sm:$0xff] }
 0x887   :  { %3222 = vmatprep.mubr.msk.f32.mxu1 %vm406_vm0, %v372_v24 }
 0x88a   :  { %3223 = vmatmul.mubr.msk.f32.gmra.mrb[14].mxu1 %vm406_vm0, %v373_v49 }
 0x88b   :  { %3236 = vmatprep.mubr.msk.f32.mxu1 %vm4125_vm1, %v4124_v14 }
 0x894   :  { %v3501_v56 = vpop.permute.xlu1 %3500 }
 0x895   :  { %v3503_v57 = vunpack.i.h.bf16 %v3501_v56  ;;  %v3502_v58 = vunpack.i.l.bf16 %v3501_v56 }
 0x897   :  { %v3386_v63 = vpack.c.bf16 %v3503_v57, %v3502_v58 }
 0x951   :  { %v3196_v60 = vpop.f32.mrb[10].mxu1 }
 0x952   :  { %v4564_v61 = vadd.f32 %v3196_v60, %v2952_v59  ;;  %v1563_v62 = vpop.f32.mrb[11].mxu1 }
 0x953   :  { %v1564_v0 = vadd.f32 %v2952_v59, %v1563_v62  ;;  %v377_v62 = vld [vmem:[#allocation7 + $0x8] sm:$0xff] }
 0x954   :  { %vm2196_vm8 = vcmp.gt.f32.partialorder %v377_v62, 0.0 }
 0x955   :  { %1933 = vrot.lane.b32.xlu0 %v1564_v0, %s4126_s26  ;;  %3230 = vmatmul.mubr.msk.f32.vlgmr.msra.gmra.mrb[18].mxu0 %vm650_vm2, %v1564_v0 }
 0x956   :  { %3388 = vmatpush3.bf16.xpose.msk.msra.mxu0 %vm4547_vm6, %v3386_v63  ;;  %3243 = vmatprep.mubr.msk.f32.mxu0 %vm4125_vm1, %v4124_v14 }
 0x957   :  { %3396 = vmatprep.subr.bf16.mxu0 %v4128_v23 }
 0x959   :  { %v3221_v15 = vpop.f32.mrb[12].mxu1 }
 0x95a   :  { %v1753_v17 = vadd.f32 %v3221_v15, %v2960_v16  ;;  %v1747_v18 = vpop.f32.mrb[13].mxu1 }
 0x95b   :  { %v1748_v19 = vadd.f32 %v2960_v16, %v1747_v18 }
 0x95d   :  { %v3504_v20 = vpack.i.bf16 %v1753_v17, %v1748_v19  ;;  %v3383_v21 = vpack.c.bf16 %v1753_v17, %v1748_v19  ;;  %v3224_v44 = vpop.f32.mrb[14].mxu1 }
 0x95e   :  { %v4601_v45 = vadd.f32 %v3224_v44, %v2960_v16  ;;  %v1757_v47 = vpop.f32.mrb[15].mxu1 }
 0x95f   :  { %3384 = vmatpush3.bf16.msra.mxu1 %v3383_v21  ;;  %v4603_v50 = vadd.f32 %v2960_v16, %v1757_v47 }
 0x960   :  { %3389 = vmatprep.subr.bf16.mxu1 %v4128_v23 }
 0x961   :  { %v3514_v52 = vpack.i.bf16 %v4601_v45, %v4603_v50  ;;  %v3397_v53 = vpack.c.bf16 %v4601_v45, %v4603_v50 }
 0x9c7   :  { %v1934_v5 = vpop.permute.xlu0 %1933 }
 0x9c8   :  { %3244 = vmatmul.mubr.msk.f32.vlgmr.msra.gmra.mrb[20].mxu0 %vm650_vm2, %v1934_v5 }
 0x9c9   :  { %3264 = vmatprep.mubr.msk.f32.mxu0 %vm4125_vm1, %v4124_v14  ;;  %3398 = vmatpush3.bf16.msra.mxu0 %v3397_v53 }
 0x9ca   :  { %3399 = vmatprep.subr.bf16.mxu0 %v4128_v23 }
 0xa28   :  { %v1841_v8 = vpop.f32.mrb[18].mxu0 }
 0xa29   :  { %v1845_v9 = vmul.f32 0.25, %v1841_v8  ;;  %v3231_v10 = vpop.f32.mrb[19].mxu0 }
 0xa2b   :  { %v1847_v11 = vsel %vm1846_vm7, -1e+30, %v1845_v9 }
 0xa2c   :  { %v1848_v13 = vsel %vm650_vm2, %v1847_v11, -inf }
 0xa2d   :  { %1849 = vmax.xlane.f32.xlu1 %v1848_v13 }
 0xa9b   :  { %v2011_v22 = vpop.f32.mrb[20].mxu0 }
 0xa9c   :  { %v2015_v24 = vmul.f32 0.25, %v2011_v22  ;;  %v3245_v25 = vpop.f32.mrb[21].mxu0 }
 0xa9e   :  { %v2016_v26 = vsel %vm1846_vm7, -1e+30, %v2015_v24 }
 0xa9f   :  { %v2017_v27 = vsel %vm650_vm2, %v2016_v26, -inf }
 0xaa0   :  { %2018 = vmax.xlane.f32.xlu0 %v2017_v27 }
 0xaba   :  { %v1850_v28 = vpop.xlane.xlu1 %1849 }
 0xabb   :  { %v1851_v29 = vsub.f32 %v1847_v11, %v1850_v28 }
 0xabd   :  { %v1852_v30 = vmul.f32 1.442695, %v1851_v29 }
 0xabf   :  { %3539 = vpow2.f32 %v1852_v30 }
 0xac9   :  { %v3540_v31 = vpop.eup %3539 }
 0xaca   :  { %v1854_v32 = vsel %vm650_vm2, %v3540_v31, 0.0 }
 0xacb   :  { %1855 = vadd.xlane.f32.xlu1 %v1854_v32 }
 0xadc   :  { %3505 = vrot.lane.b32.xlu1 %v3504_v20, %s4126_s26 }
 0xae0   :  { %2284 = vrot.lane.b32.xlu1 %v4564_v61, %s4126_s26 }
 0xb2d   :  { %v2019_v34 = vpop.xlane.xlu0 %2018 }
 0xb2e   :  { %v2020_v33 = vsub.f32 %v2016_v26, %v2019_v34 }
 0xb30   :  { %v2021_v35 = vmul.f32 1.442695, %v2020_v33 }
 0xb32   :  { %3541 = vpow2.f32 %v2021_v35 }
 0xb3c   :  { %v3542_v36 = vpop.eup %3541 }
 0xb3d   :  { %v2023_v37 = vsel %vm650_vm2, %v3542_v36, 0.0 }
 0xb3e   :  { %2024 = vadd.xlane.f32.xlu0 %v2023_v37  ;;  %v1479_v37 = vld [vmem:[#allocation25 + $0x8] sm:$0xff] }
 0xb58   :  { %v1856_v39 = vpop.xlane.xlu1 %1855 }
 0xb59   :  { %3543 = vrcp.f32 %v1856_v39  ;;  %v1480_v39 = vld [vmem:[#allocation25 + $0x10] sm:$0xff] }
 0xb5c   :  { %v3506_v41 = vpop.permute.xlu1 %3505 }
 0xb5d   :  { %v3508_v42 = vunpack.i.h.bf16 %v3506_v41  ;;  %v3507_v43 = vunpack.i.l.bf16 %v3506_v41 }
 0xb5f   :  { %v3390_v49 = vpack.c.bf16 %v3508_v42, %v3507_v43  ;;  %v1481_v42 = vld [vmem:[#allocation25 + $0x18] sm:$0xff] }
 0xb60   :  { %v2285_v2 = vpop.permute.xlu1 %2284  ;;  %v3410_v43 = vpack.c.bf16 %v1481_v42, %v1480_v39 }
 0xb63   :  { %v3544_v48 = vpop.eup %3543 }
 0xb64   :  { %v1858_v51 = vmul.f32 %v3544_v48, %v3540_v31 }
 0xb66   :  { %1859 = vst.msk [vmem:[#allocation35] sm:$0xff] %vm650_vm2, %v1858_v51  ;;  %3237 = vmatmul.mubr.msk.f32.vlgmr.msra.gmra.mrb[16].mxu1 %vm650_vm2, %v1858_v51 }
 0xb67   :  { %3391 = vmatpush3.bf16.msra.mxu1 %v3390_v49  ;;  %3250 = vmatprep.mubr.msk.f32.mxu1 %vm4125_vm1, %v4124_v14  ;;  %v2981_v49 = vld [vmem:[%s4745_s2] ss:$0 sm:$0xff] }
 0xb68   :  { %3392 = vmatprep.subr.bf16.mxu1 %v4128_v23 }
 0xbcb   :  { %v2025_v54 = vpop.xlane.xlu0 %2024 }
 0xbcc   :  { %3545 = vrcp.f32 %v2025_v54 }
 0xbd6   :  { %v3546_v55 = vpop.eup %3545 }
 0xbd7   :  { %v2027_v56 = vmul.f32 %v3546_v55, %v3542_v36  ;;  %v1478_v36 = vld [vmem:[#allocation25] sm:$0xff] }
 0xbd8   :  { %v3406_v41 = vpack.c.bf16 %v1479_v37, %v1478_v36 }
 0xbd9   :  { %2029 = vst.msk [vmem:[#allocation35 + $0x8] sm:$0xff] %vm650_vm2, %v2027_v56  ;;  %3251 = vmatmul.mubr.msk.f32.vlgmr.msra.gmra.mrb[18].mxu1 %vm650_vm2, %v2027_v56 }
 0xbda   :  { %3395 = vmatpush3.bf16.xpose.msk.msra.mxu1 %vm4547_vm6, %v3393_v7  ;;  %3257 = vmatprep.mubr.msk.f32.mxu1 %vm4125_vm1, %v4124_v14 }
 0xbdb   :  { %3403 = vmatprep.subr.bf16.mxu1 %v4128_v23 }
 0xbe1   :  { %3258 = vmatmul.mubr.msk.f32.vlgmr.msra.gmra.mrb[20].mxu1 %vm650_vm2, %v4564_v61 }
 0xbe2   :  { %3278 = vmatprep.mubr.msk.f32.mxu1 %vm4125_vm1, %v4124_v14 }
 0xc39   :  { %v4629_v57 = vpop.f32.mrb[16].mxu1 }
 0xc3a   :  { %v3238_v58 = vpop.f32.mrb[17].mxu1 }
 0xcac   :  { %v2107_v59 = vpop.f32.mrb[18].mxu1 }
 0xcad   :  { %v3252_v60 = vpop.f32.mrb[19].mxu1 }
 0xcb4   :  { %v2191_v63 = vpop.f32.mrb[20].mxu1 }
 0xcb5   :  { %v2195_v0 = vmul.f32 0.25, %v2191_v63  ;;  %v3259_v1 = vpop.f32.mrb[21].mxu1 }
 0xcb7   :  { %v2197_v3 = vsel %vm2196_vm8, -1e+30, %v2195_v0 }
 0xcb8   :  { %v2198_v23 = vsel %vm650_vm2, %v2197_v3, -inf }
 0xcb9   :  { %2199 = vmax.xlane.f32.xlu0 %v2198_v23  ;;  %v2598_v23 = vld [vmem:[#allocation29] sm:$0xff] }
 0xd46   :  { %v2200_v7 = vpop.xlane.xlu0 %2199 }
 0xd47   :  { %v2201_v61 = vsub.f32 %v2197_v3, %v2200_v7  ;;  %v2599_v7 = vld [vmem:[#allocation29 + $0x8] sm:$0xff] }
 0xd49   :  { %v2202_v5 = vmul.f32 1.442695, %v2201_v61  ;;  %v3414_v61 = vpack.c.bf16 %v2599_v7, %v2598_v23 }
 0xd4b   :  { %3547 = vpow2.f32 %v2202_v5  ;;  %v2600_v5 = vld [vmem:[#allocation29 + $0x10] sm:$0xff] }
 0xd55   :  { %v3548_v12 = vpop.eup %3547 }
 0xd56   :  { %v2204_v8 = vsel %vm650_vm2, %v3548_v12, 0.0 }
 0xd57   :  { %2205 = vadd.xlane.f32.xlu0 %v2204_v8 }
 0xd6d   :  { %3510 = vrot.lane.b32.xlu0 %v3509_v6, %s4126_s26 }
 0xde4   :  { %v2206_v9 = vpop.xlane.xlu0 %2205 }
 0xde5   :  { %3549 = vrcp.f32 %v2206_v9  ;;  %v2692_v9 = vld [vmem:[%s4746_s25] sm:$0xff] }
 0xde8   :  { %v3511_v10 = vpop.permute.xlu0 %3510 }
 0xde9   :  { %v3513_v11 = vunpack.i.h.bf16 %v3511_v10  ;;  %v3512_v13 = vunpack.i.l.bf16 %v3511_v10  ;;  %v2693_v10 = vld [vmem:[%s4746_s25 + $0x8] sm:$0xff] }
 0xdeb   :  { %v3400_v17 = vpack.c.bf16 %v3513_v11, %v3512_v13  ;;  %v2694_v11 = vld [vmem:[%s4746_s25 + $0x10] sm:$0xff]  ;;  %v3422_v13 = vpack.c.bf16 %v2693_v10, %v2692_v9 }
 0xdef   :  { %v3550_v15 = vpop.eup %3549 }
 0xdf0   :  { %v2208_v16 = vmul.f32 %v3550_v15, %v3548_v12  ;;  %v2601_v12 = vld [vmem:[#allocation29 + $0x18] sm:$0xff] }
 0xdf1   :  { %v3418_v8 = vpack.c.bf16 %v2601_v12, %v2600_v5  ;;  %v2695_v15 = vld [vmem:[%s4746_s25 + $0x18] sm:$0xff] }
 0xdf2   :  { %2210 = vst.msk [vmem:[#allocation35 + $0x10] sm:$0xff] %vm650_vm2, %v2208_v16  ;;  %3265 = vmatmul.mubr.msk.f32.vlgmr.msra.gmra.mrb[22].mxu0 %vm650_vm2, %v2208_v16  ;;  %v3426_v16 = vpack.c.bf16 %v2695_v15, %v2694_v11 }
 0xdf3   :  { %3402 = vmatpush3.bf16.xpose.msk.msra.mxu0 %vm4547_vm6, %v3400_v17  ;;  %3271 = vmatprep.mubr.msk.f32.mxu0 %vm4125_vm1, %v4124_v14  ;;  %v2696_v17 = vld [vmem:[%s4746_s25 + $0x20] sm:$0xff] }
 0xdf4   :  { %3415 = vmatprep.subr.bf16.mxu0 %v3414_v61 }
 0xdfa   :  { %3272 = vmatmul.mubr.msk.f32.vlgmr.msra.gmra.mrb[24].mxu0 %vm650_vm2, %v2285_v2  ;;  %v2697_v2 = vld [vmem:[%s4746_s25 + $0x28] sm:$0xff] }
 0xdfb   :  { %3417 = vmatpush3.bf16.msra.mxu0 %v3414_v61 }
 0xdfc   :  { %3419 = vmatprep.subr.bf16.mxu0 %v3418_v8 }
 0xdff   :  { %3421 = vmatpush3.bf16.msra.mxu0 %v3418_v8 }
 0xec5   :  { %v2280_v4 = vpop.f32.mrb[22].mxu0 }
 0xec6   :  { %v3266_v6 = vpop.f32.mrb[23].mxu0 }
 0xecd   :  { %v2362_v18 = vpop.f32.mrb[24].mxu0 }
 0xece   :  { %v2366_v19 = vmul.f32 0.25, %v2362_v18  ;;  %v3273_v20 = vpop.f32.mrb[25].mxu0 }
 0xed0   :  { %v2367_v21 = vsel %vm2196_vm8, -1e+30, %v2366_v19 }
 0xed1   :  { %v2368_v22 = vsel %vm650_vm2, %v2367_v21, -inf }
 0xed2   :  { %2369 = vmax.xlane.f32.xlu1 %v2368_v22 }
 0xee3   :  { %3515 = vrot.lane.b32.xlu1 %v3514_v52, %s4126_s26 }
 0xf5f   :  { %v2370_v46 = vpop.xlane.xlu1 %2369 }
 0xf60   :  { %v2371_v24 = vsub.f32 %v2367_v21, %v2370_v46 }
 0xf62   :  { %v2372_v25 = vmul.f32 1.442695, %v2371_v24  ;;  %v2984_v24 = vld [vmem:[#allocation26] ss:$0 sm:$0xff] }
 0xf63   :  { %v3516_v26 = vpop.permute.xlu1 %3515 }
 0xf64   :  { %3551 = vpow2.f32 %v2372_v25  ;;  %v3518_v14 = vunpack.i.h.bf16 %v3516_v26  ;;  %v3517_v27 = vunpack.i.l.bf16 %v3516_v26 }
 0xf66   :  { %v3404_v28 = vpack.c.bf16 %v3518_v14, %v3517_v27  ;;  %v2985_v27 = vld [vmem:[#allocation28] ss:$0 sm:$0xff] }
 0xf68   :  { %3405 = vmatpush3.bf16.msra.mxu1 %v3404_v28 }
 0xf69   :  { %3407 = vmatprep.subr.bf16.mxu1 %v3406_v41 }
 0xf6e   :  { %v3552_v29 = vpop.eup %3551 }
 0xf6f   :  { %v2374_v30 = vsel %vm650_vm2, %v3552_v29, 0.0 }
 0xf70   :  { %2375 = vadd.xlane.f32.xlu0 %v2374_v30 }
 0xf86   :  { %2112 = vrot.lane.b32.xlu0 %v2107_v59, %s4127_s28 }
 0xffd   :  { %v2376_v31 = vpop.xlane.xlu0 %2375 }
 0xffe   :  { %3553 = vrcp.f32 %v2376_v31 }
0x1001   :  { %v2113_v34 = vpop.permute.xlu0 %2112 }
0x1002   :  { %v2115_v35 = vsel %vm650_vm2, %v4629_v57, %v2113_v34  ;;  %v2699_v34 = vld [vmem:[%s4746_s25 + $0x38] sm:$0xff] }
0x1008   :  { %v3554_v32 = vpop.eup %3553 }
0x1009   :  { %v2378_v33 = vmul.f32 %v3554_v32, %v3552_v29  ;;  %v2698_v32 = vld [vmem:[%s4746_s25 + $0x30] sm:$0xff] }
0x100b   :  { %2380 = vst.msk [vmem:[#allocation35 + $0x18] sm:$0xff] %vm650_vm2, %v2378_v33  ;;  %3279 = vmatmul.mubr.msk.f32.vlgmr.msra.gmra.mrb[22].mxu1 %vm650_vm2, %v2378_v33  ;;  %v3434_v33 = vpack.c.bf16 %v2699_v34, %v2698_v32 }
0x100c   :  { %3289 = vmatprep.mubr.msk.f32.mxu1 %vm406_vm0, %v2115_v35  ;;  %3409 = vmatpush3.bf16.msra.mxu1 %v3406_v41  ;;  %v2986_v35 = vld [vmem:[#allocation31] ss:$0 sm:$0xff] }
0x100d   :  { %3411 = vmatprep.subr.bf16.mxu1 %v3410_v43 }
0x1010   :  { %3413 = vmatpush3.bf16.msra.mxu1 %v3410_v43 }
0x1011   :  { %3423 = vmatprep.subr.bf16.mxu1 %v3422_v13 }
0x10de   :  { %v2458_v44 = vpop.f32.mrb[22].mxu1 }
0x10df   :  { %2463 = vrot.lane.b32.xlu1 %v2458_v44, %s4127_s28  ;;  %v3280_v45 = vpop.f32.mrb[23].mxu1  ;;  %v2989_v44 = vld [vmem:[%s4747_s5] ss:$0 sm:$0xff] }
0x1151   :  { %v2464_v47 = vpop.permute.xlu1 %2463 }
0x1152   :  { %v2466_v48 = vsel %vm650_vm2, %v2280_v4, %v2464_v47  ;;  %v3430_v4 = vpack.c.bf16 %v2697_v2, %v2696_v17 }
0x1153   :  { %3290 = vmatmul.mubr.msk.f32.vlgmr.msra.gmra.mrb[24].mxu1 %vm406_vm0, %v2466_v48 }
0x1154   :  { %3425 = vmatpush3.bf16.msra.mxu1 %v3422_v13 }
0x1155   :  { %3427 = vmatprep.subr.bf16.mxu1 %v3426_v16 }
0x1158   :  { %3429 = vmatpush3.bf16.msra.mxu1 %v3426_v16 }
0x1159   :  { %3431 = vmatprep.subr.bf16.mxu1 %v3430_v4 }
0x115c   :  { %3433 = vmatpush3.bf16.msra.mxu1 %v3430_v4 }
0x115d   :  { %3435 = vmatprep.subr.bf16.mxu1 %v3434_v33 }
0x1160   :  { %3437 = vmatpush3.bf16.msra.mxu1 %v3434_v33 }
0x1226   :  { %v3291_v50 = vpop.f32.mrb[24].mxu1 }
0x1227   :  { %v2551_v51 = vadd.f32 %v3291_v50, %v2981_v49  ;;  %v2545_v52 = vpop.f32.mrb[25].mxu1 }
0x1228   :  { %v2546_v53 = vadd.f32 %v2981_v49, %v2545_v52 }
0x1229   :  { %v2555_v54 = vadd.f32 %v2551_v51, %v4540_v40 }
0x122a   :  { %v2554_v55 = vadd.f32 %v2546_v53, %v4536_v38 }
0x122b   :  { %v2559_v56 = vsel %vm406_vm0, %v2555_v54, 0.0 }
0x122c   :  { %2560 = vadd.xlane.f32.xlu0 %v2559_v56  ;;  %v2556_v57 = vsel %vm406_vm0, %v2554_v55, 0.0 }
0x122d   :  { %2557 = vadd.xlane.f32.xlu1 %v2556_v57 }
0x12b9   :  { %v2561_v58 = vpop.xlane.xlu0 %2560 }
0x12ba   :  { %v2563_v59 = vmul.f32 0.03125, %v2561_v58  ;;  %v2558_v60 = vpop.xlane.xlu1 %2557 }
0x12bb   :  { %v2562_v62 = vmul.f32 0.03125, %v2558_v60 }
0x12bc   :  { %v2565_v63 = vsub.f32 %v2555_v54, %v2563_v59 }
0x12bd   :  { %v2564_v0 = vsub.f32 %v2554_v55, %v2562_v62 }
0x12be   :  { %v2567_v1 = vmul.f32 %v2565_v63, %v2565_v63 }
0x12bf   :  { %v2566_v3 = vmul.f32 %v2564_v0, %v2564_v0 }
0x12c0   :  { %v2571_v40 = vsel %vm406_vm0, %v2567_v1, 0.0 }
0x12c1   :  { %2572 = vadd.xlane.f32.xlu0 %v2571_v40  ;;  %v2568_v38 = vsel %vm406_vm0, %v2566_v3, 0.0 }
0x12c2   :  { %2569 = vadd.xlane.f32.xlu1 %v2568_v38 }
0x134e   :  { %v2573_v6 = vpop.xlane.xlu0 %2572 }
0x134f   :  { %v2575_v18 = vmul.f32 0.03125, %v2573_v6  ;;  %v2570_v19 = vpop.xlane.xlu1 %2569 }
0x1350   :  { %v2574_v20 = vmul.f32 0.03125, %v2570_v19 }
0x1351   :  { %v2577_v21 = vadd.f32 1e-05, %v2575_v18 }
0x1352   :  { %v2576_v22 = vadd.f32 1e-05, %v2574_v20 }
0x1353   :  { %3555 = vrsqrt.f32 %v2577_v21 }
0x1354   :  { %3557 = vrsqrt.f32 %v2576_v22 }
0x135d   :  { %v3556_v46 = vpop.eup %3555 }
0x135e   :  { %v3558_v25 = vpop.eup %3557  ;;  %v2581_v26 = vmul.f32 %v3556_v46, %v2565_v63 }
0x135f   :  { %v2580_v14 = vmul.f32 %v3558_v25, %v2564_v0 }
0x1360   :  { %v2589_v28 = vmul.f32 %v2984_v24, %v2581_v26 }
0x1361   :  { %v2588_v29 = vmul.f32 %v2984_v24, %v2580_v14 }
0x1362   :  { %v2597_v31 = vadd.f32 %v2985_v27, %v2589_v28 }
0x1363   :  { %v2596_v30 = vadd.f32 %v2985_v27, %v2588_v29 }
0x1365   :  { %3300 = vmatprep.mubr.msk.f32.mxu0 %vm406_vm0, %v2596_v30 }
0x1366   :  { %3301 = vmatmul.mubr.msk.f32.vlgmr.msra.gmra.mrb[26].mxu0 %vm406_vm0, %v2597_v31 }
0x1439   :  { %v3302_v36 = vpop.f32.mrb[26].mxu0 }
0x143a   :  { %v2687_v37 = vadd.f32 %v3302_v36, %v2986_v35  ;;  %v2681_v39 = vpop.f32.mrb[27].mxu0 }
0x143b   :  { %v2682_v41 = vadd.f32 %v2986_v35, %v2681_v39 }
0x143c   :  { %v2691_v43 = vmax.f32 %v2687_v37, 0.0 }
0x143d   :  { %v2690_v42 = vmax.f32 %v2682_v41, 0.0 }
0x143f   :  { %3319 = vmatprep.mubr.msk.f32.mxu1 %vm2707_vm9, %v2690_v42 }
0x1440   :  { %3320 = vmatmul.mubr.msk.f32.vlgmr.msra.gmra.mrb[26].mxu1 %vm2707_vm9, %v2691_v43 }
0x1513   :  { %v3321_v45 = vpop.f32.mrb[26].mxu1 }
0x1514   :  { %v2786_v47 = vadd.f32 %v3321_v45, %v2989_v44  ;;  %v2780_v48 = vpop.f32.mrb[27].mxu1 }
0x1515   :  { %v2781_v49 = vadd.f32 %v2989_v44, %v2780_v48 }
0x1516   :  { %v2790_v50 = vadd.f32 %v2786_v47, %v2597_v31 }
0x1517   :  { %v2789_v51 = vadd.f32 %v2781_v49, %v2596_v30 }
0x1518   :  { %v2796_v52 = vsel %vm406_vm0, %v2790_v50, 0.0 }
0x1519   :  { %2797 = vadd.xlane.f32.xlu0 %v2796_v52  ;;  %v2793_v53 = vsel %vm406_vm0, %v2789_v51, 0.0 }
0x151a   :  { %2794 = vadd.xlane.f32.xlu1 %v2793_v53 }
0x15a6   :  { %v2798_v54 = vpop.xlane.xlu0 %2797 }
0x15a7   :  { %v2800_v55 = vmul.f32 0.03125, %v2798_v54  ;;  %v2795_v56 = vpop.xlane.xlu1 %2794 }
0x15a8   :  { %v2799_v57 = vmul.f32 0.03125, %v2795_v56 }
0x15a9   :  { %v2802_v58 = vsub.f32 %v2790_v50, %v2800_v55 }
0x15aa   :  { %v2801_v59 = vsub.f32 %v2789_v51, %v2799_v57 }
0x15ab   :  { %v2804_v60 = vmul.f32 %v2802_v58, %v2802_v58 }
0x15ac   :  { %v2803_v62 = vmul.f32 %v2801_v59, %v2801_v59 }
0x15ad   :  { %v2808_v63 = vsel %vm406_vm0, %v2804_v60, 0.0 }
0x15ae   :  { %2809 = vadd.xlane.f32.xlu0 %v2808_v63  ;;  %v2805_v0 = vsel %vm406_vm0, %v2803_v62, 0.0 }
0x15af   :  { %2806 = vadd.xlane.f32.xlu1 %v2805_v0 }
0x15b0   :  { %3992 = shalt.err (!%p3989_p2)
}
0x15b1   :  { %s3993_s17 = scalar_lea.hbm %s4295_s19, 512 }
0x15b2   :  { %p3994_p3 = scmp.ne.s32.totalorder %s4295_s19, %s3993_s17  ;;  %p3997_p4 = scmp.lt.u32.totalorder %s3993_s17, %s4295_s19 }
0x15b4   :  { %p3999_p5 = pnand %p3997_p4, %p3994_p3 }
0x15b6   :  { %4002 = shalt.err (!%p3999_p5)
}
0x15b7   :  { %2860 = dma.vmem_to_hbm [thread:$0]  %s2855_s7, 512, %s4295_s19, [#allocation34], %s4105_s11, %s4105_s11, %s4106_s15  }
0x15b8   :  { %s4130_s20 = smov [#allocation35]  }
0x15b9   :  { %s2866_s8 = sshll.u32 %s4130_s20, 4  ;;  %s2867_s8 = int_to_ptr.vmem [resolvable:$true] %s2866_s8 }
0x15ba   :  { %s4003_s16 = scalar_lea.vmem %s2867_s8, 512  ;;  %p4008_p7 = scmp.lt.s32.totalorder %s2867_s8, %s2867_s8 }
0x15bb   :  { %p4004_p6 = scmp.ne.s32.totalorder %s2867_s8, %s4003_s16  ;;  %p4009_p8 = scmp.lt.s32.totalorder %s4003_s16, %s4003_s16 }
0x15bd   :  { %p4010_p9 = por %p4009_p8, %p4008_p7 }
0x15bf   :  { %p4011_p10 = pnand %p4010_p9, %p4004_p6 }
0x15c1   :  { %4014 = shalt.err (!%p4011_p10)
}
0x15c2   :  { %s4015_s18 = scalar_lea.hbm %s4300_s12, 512 }
0x15c3   :  { %p4016_p11 = scmp.ne.s32.totalorder %s4300_s12, %s4015_s18  ;;  %p4019_p12 = scmp.lt.u32.totalorder %s4015_s18, %s4300_s12 }
0x15c5   :  { %p4021_p13 = pnand %p4019_p12, %p4016_p11 }
0x15c7   :  { %4024 = shalt.err (!%p4021_p13)
}
0x15c8   :  { %s4748_s19 = sld [smem:[#allocation62_spill]]  ;;  %v2993_v10 = vld [vmem:[%s4285_s21] ss:$0 sm:$0xff]  ;;  %s4131_s4 = smov [#allocation32]  }
0x15c9   :  { %2872 = dma.vmem_to_hbm [thread:$0]  %s2867_s8, 512, %s4300_s12, [#allocation34], %s4105_s11, %s4105_s11, %s4106_s15  }
0x15ca   :  { %s2842_s3 = sshll.u32 %s4131_s4, 4  ;;  %s2843_s3 = int_to_ptr.vmem [resolvable:$true] %s2842_s3 }
0x15cb   :  { %s4025_s12 = scalar_lea.vmem %s2843_s3, 256  ;;  %p4030_p1 = scmp.lt.s32.totalorder %s2843_s3, %s2843_s3 }
0x15cc   :  { %p4026_p0 = scmp.ne.s32.totalorder %s2843_s3, %s4025_s12  ;;  %p4031_p2 = scmp.lt.s32.totalorder %s4025_s12, %s4025_s12 }
0x15ce   :  { %v2992_v5 = vld [vmem:[%s4748_s19] ss:$0 sm:$0xff]  ;;  %p4032_p3 = por %p4031_p2, %p4030_p1 }
0x15d0   :  { %p4033_p4 = pnand %p4032_p3, %p4026_p0 }
0x163b   :  { %v2810_v1 = vpop.xlane.xlu0 %2809 }
0x163c   :  { %v2812_v3 = vmul.f32 0.03125, %v2810_v1  ;;  %v2807_v40 = vpop.xlane.xlu1 %2806 }
0x163d   :  { %v2811_v38 = vmul.f32 0.03125, %v2807_v40 }
0x163e   :  { %v2814_v23 = vadd.f32 1e-05, %v2812_v3 }
0x163f   :  { %v2813_v7 = vadd.f32 1e-05, %v2811_v38 }
0x1640   :  { %3559 = vrsqrt.f32 %v2814_v23 }
0x1641   :  { %3561 = vrsqrt.f32 %v2813_v7 }
0x164a   :  { %v3560_v61 = vpop.eup %3559 }
0x164b   :  { %v3562_v12 = vpop.eup %3561  ;;  %v2818_v8 = vmul.f32 %v3560_v61, %v2802_v58 }
0x164c   :  { %v2817_v9 = vmul.f32 %v3562_v12, %v2801_v59 }
0x164d   :  { %v2826_v11 = vmul.f32 %v2992_v5, %v2818_v8 }
0x164e   :  { %v2825_v13 = vmul.f32 %v2992_v5, %v2817_v9 }
0x164f   :  { %v2834_v15 = vadd.f32 %v2993_v10, %v2826_v11 }
0x1650   :  { %v2833_v16 = vadd.f32 %v2993_v10, %v2825_v13 }
0x1651   :  { %2836 = vst.msk [vmem:[#allocation32 + $0x8] sm:$0xff] %vm406_vm0, %v2834_v15 }
0x1652   :  { %2835 = vst.msk [vmem:[#allocation32] sm:$0xff] %vm406_vm0, %v2833_v16 }
0x1653   :  { %4036 = shalt.err (!%p4033_p4)
}
0x1654   :  { %s4037_s21 = scalar_lea.hbm %s4290_s27, 256 }
0x1655   :  { %p4038_p5 = scmp.ne.s32.totalorder %s4290_s27, %s4037_s21  ;;  %p4041_p6 = scmp.lt.u32.totalorder %s4037_s21, %s4290_s27 }
0x1657   :  { %p4043_p7 = pnand %p4041_p6, %p4038_p5 }
0x1659   :  { %4046 = shalt.err (!%p4043_p7)
}
0x165a   :  { %2848 = dma.vmem_to_hbm [thread:$0]  %s2843_s3, 256, %s4290_s27, [#allocation4], %s4105_s11, %s4105_s11, %s4106_s15  }
0x165b   :  { %4067 = dma.done.wait [#allocation4], 256  }
0x165c   :  { %4068 = vsyncadd [#allocation4], 4294967040 }
0x165d   :  { %4069 = dma.done.wait [#allocation34], 1024  }
0x165e   :  { %4070 = vsyncadd [#allocation34], 4294966272 }
0x165f   :  { %2882 = vsyncpa [#allocation3], 1 }
0x1660   :  { %2883 = vsyncpa [#allocation6], 1 }
0x1661   :  { %2884 = vsyncpa [#allocation9], 1 }
0x1662   :  { %2885 = vsyncpa [#allocation12], 1 }
0x1663   :  { %2886 = vsyncpa [#allocation15], 1 }
0x1664   :  { %2887 = vsyncpa [#allocation18], 1 }
0x1665   :  { %2888 = vsyncpa [#allocation21], 1 }
0x1666   :  { %2889 = vsyncpa [#allocation24], 1 }
0x1667   :  { %2890 = vsyncpa [#allocation27], 1 }
0x1668   :  { %2891 = vsyncpa [#allocation30], 1 }
0x1669   :  { %2892 = vsyncpa [#allocation4], 1 }
0x166a   :  { %2893 = vsyncpa [#allocation34], 1 }

</bundles_post_ra>
